<compile_context>
chip_gen: v6e
topology: v6e:2x2x1
jax: 0.10.0
libtpu: 0.0.40
codegen_flags: <defaults>
</compile_context>

<pallas_src>
import math
import functools

import jax
import jax.numpy as jnp
from jax.experimental import pallas as pl
from jax.experimental.pallas import tpu as pltpu

EPS = 1e-5  # nn.LayerNorm default
_SQRT_2_OVER_PI = 0.7978845608028654


def _decoder_layer_kernel(
    x_ref,            # (TM, D)   input rows
    g1_ref, b1_ref,   # (1, D)    norm1 gamma / beta
    w1_ref, c1_ref,   # (D, D) bf16, (1, D) f32   MLP linear-1
    w2_ref, c2_ref,   # (D, D) bf16, (1, D) f32   MLP linear-2
    g2_ref, b2_ref,   # (1, D)    norm2 gamma / beta
    wp_ref, cp_ref,   # (D, O) bf16, (1, O) f32   linear_pred
    dec_ref,          # (TM, D)   dec_output
    pred_ref,         # (TM, O)   layer_predict
):
    d = x_ref.shape[-1]
    inv_d = 1.0 / d

    x = x_ref[...].astype(jnp.float32)

    # x = x + dropout(x)   (eval mode -> identity)
    x = x + x

    def layernorm(v, g, b):
        mu = jnp.sum(v, axis=-1, keepdims=True) * inv_d
        vc = v - mu
        var = jnp.sum(vc * vc, axis=-1, keepdims=True) * inv_d
        return vc * jax.lax.rsqrt(var + EPS) * g + b

    # ---- LayerNorm 1 ----
    xn = layernorm(x, g1_ref[...], b1_ref[...])

    # ---- MLP1: Linear -> GELU (tanh approx, EUP) -> Linear ----
    h = jnp.dot(xn.astype(jnp.bfloat16), w1_ref[...],
                preferred_element_type=jnp.float32) + c1_ref[...]
    h = 0.5 * h * (1.0 + jnp.tanh(_SQRT_2_OVER_PI * (h + 0.044715 * h * h * h)))
    y = jnp.dot(h.astype(jnp.bfloat16), w2_ref[...],
                preferred_element_type=jnp.float32) + c2_ref[...]

    # ---- residual + LayerNorm 2 ----
    dec = layernorm(xn + y, g2_ref[...], b2_ref[...])
    dec_ref[...] = dec.astype(dec_ref.dtype)

    # ---- linear_pred ----
    pred_ref[...] = (
        jnp.dot(dec.astype(jnp.bfloat16), wp_ref[...],
                preferred_element_type=jnp.float32) + cp_ref[...]
    ).astype(pred_ref.dtype)


def _pick_tile_rows(n_rows, tile_rows):
    """Row tile: full-extent single block for small N (always layout-legal,
    zero padding); otherwise 256-aligned tiles (MXU-native on all gens)."""
    tile_rows = max(256, (int(tile_rows) // 256) * 256)
    if n_rows <= tile_rows:
        return n_rows
    return tile_rows


def pack_params(params):
    """One-time packing (call OUTSIDE the per-step path): cast matmul weights
    to bf16 for the MXU, keep LayerNorm gains/biases and linear biases in f32.
    No padding is required because the kernel uses full-extent feature blocks."""
    bf16, f32 = jnp.bfloat16, jnp.float32
    return {
        "g1": params["g1"].astype(f32), "b1": params["b1"].astype(f32),
        "w1": params["w1"].astype(bf16), "c1": params["c1"].astype(f32),
        "w2": params["w2"].astype(bf16), "c2": params["c2"].astype(f32),
        "g2": params["g2"].astype(f32), "b2": params["b2"].astype(f32),
        "wp": params["wp"].astype(bf16), "cp": params["cp"].astype(f32),
    }


def decoder_layer_forward(x, packed, *, tile_rows=512, out_dtype=jnp.float32,
                          single_buffer_weights=True):
    """x: (B, L, d_model). packed: output of pack_params().
    Returns (dec_output (B,L,D), layer_predict (B,L,out_seg_num))."""
    B, L, D = x.shape
    O = packed["wp"].shape[1]
    N = B * L

    x2d = x.reshape(N, D)                 # metadata-only reshape, no HBM copy

    tm = _pick_tile_rows(N, tile_rows)
    grid = (pl.cdiv(N, tm),)

    # ---- generation-aware VMEM budget (no double-counting of buffers) ----
    wbuf = 1 if single_buffer_weights else 2
    weight_bytes = wbuf * (2 * D * D * 2 + D * O * 2 + (6 * D + O) * 4)
    act_bytes = 2 * tm * (D * 4 + D * 4 + O * 4)        # x in + dec/pred out, dbl-buffered
    temp_bytes = 6 * tm * max(D, O) * 4                 # f32 temporaries headroom
    want = weight_bytes + act_bytes + temp_bytes + (4 << 20)
    try:
        cap = int(0.75 * pltpu.get_tpu_info().vmem_capacity_bytes)
    except Exception:
        cap = 48 * 1024 * 1024                          # safe on every generation
    vmem_limit = int(min(max(want, 32 * 1024 * 1024), cap))

    def row_spec(cols):
        return pl.BlockSpec((tm, cols), lambda i: (i, 0))

    if single_buffer_weights and hasattr(pl, "Buffered"):
        def inv_spec(rows, cols):
            # Grid-invariant operand: single VMEM buffer (halves weight VMEM).
            return pl.BlockSpec((rows, cols), lambda i: (0, 0),
                                pipeline_mode=pl.Buffered(1))
    else:
        def inv_spec(rows, cols):
            return pl.BlockSpec((rows, cols), lambda i: (0, 0))

    dec2d, pred2d = pl.pallas_call(
        _decoder_layer_kernel,
        out_shape=(
            jax.ShapeDtypeStruct((N, D), out_dtype),
            jax.ShapeDtypeStruct((N, O), out_dtype),
        ),
        grid_spec=pltpu.PrefetchScalarGridSpec(
            num_scalar_prefetch=0,
            grid=grid,
            in_specs=[
                row_spec(D),        # x
                inv_spec(1, D),     # gamma1
                inv_spec(1, D),     # beta1
                inv_spec(D, D),     # W1 (bf16)
                inv_spec(1, D),     # b1
                inv_spec(D, D),     # W2 (bf16)
                inv_spec(1, D),     # b2
                inv_spec(1, D),     # gamma2
                inv_spec(1, D),     # beta2
                inv_spec(D, O),     # Wp (bf16)
                inv_spec(1, O),     # bp
            ],
            out_specs=[
                row_spec(D),        # dec_output
                row_spec(O),        # layer_predict
            ],
        ),
        compiler_params=pltpu.CompilerParams(
            dimension_semantics=("parallel",),
            vmem_limit_bytes=vmem_limit,
        ),
    )(x2d, packed["g1"], packed["b1"], packed["w1"], packed["c1"],
      packed["w2"], packed["c2"], packed["g2"], packed["b2"],
      packed["wp"], packed["cp"])

    return dec2d.reshape(B, L, D), pred2d.reshape(B, L, O)


def init_params(key, d_model, out_seg_num):
    """Deterministic synthetic parameter init (shapes match the PyTorch module;
    linear weights stored (in, out) so the kernel computes x @ W)."""
    ks = jax.random.split(key, 6)
    s = 1.0 / math.sqrt(d_model)
    return {
        "g1": jnp.ones((1, d_model), jnp.float32),
        "b1": jnp.zeros((1, d_model), jnp.float32),
        "w1": jax.random.uniform(ks[0], (d_model, d_model), jnp.float32, -s, s),
        "c1": jax.random.uniform(ks[1], (1, d_model), jnp.float32, -s, s),
        "w2": jax.random.uniform(ks[2], (d_model, d_model), jnp.float32, -s, s),
        "c2": jax.random.uniform(ks[3], (1, d_model), jnp.float32, -s, s),
        "g2": jnp.ones((1, d_model), jnp.float32),
        "b2": jnp.zeros((1, d_model), jnp.float32),
        "wp": jax.random.uniform(ks[4], (d_model, out_seg_num), jnp.float32, -s, s),
        "cp": jax.random.uniform(ks[5], (1, out_seg_num), jnp.float32, -s, s),
    }


def _layernorm_ref(v, g, b):
    mu = jnp.mean(v, axis=-1, keepdims=True)
    var = jnp.mean((v - mu) ** 2, axis=-1, keepdims=True)
    return (v - mu) * jax.lax.rsqrt(var + EPS) * g + b


def _reference_exact(x, params):
    """Pure-f32, exact-erf reference of the PyTorch module (eval mode)."""
    x = x + x
    xn = _layernorm_ref(x, params["g1"], params["b1"])
    h = xn @ params["w1"] + params["c1"]
    h = 0.5 * h * (1.0 + jax.lax.erf(h / math.sqrt(2.0)))
    y = h @ params["w2"] + params["c2"]
    dec = _layernorm_ref(xn + y, params["g2"], params["b2"])
    pred = dec @ params["wp"] + params["cp"]
    return dec, pred


def _reference_matched(x, params):
    """Reference mirroring the kernel numerics (bf16 MXU inputs, tanh-GELU)."""
    bf16, f32 = jnp.bfloat16, jnp.float32
    x = x + x
    xn = _layernorm_ref(x, params["g1"], params["b1"])
    h = jnp.dot(xn.astype(bf16), params["w1"].astype(bf16),
                preferred_element_type=f32) + params["c1"]
    h = 0.5 * h * (1.0 + jnp.tanh(_SQRT_2_OVER_PI * (h + 0.044715 * h ** 3)))
    y = jnp.dot(h.astype(bf16), params["w2"].astype(bf16),
                preferred_element_type=f32) + params["c2"]
    dec = _layernorm_ref(xn + y, params["g2"], params["b2"])
    pred = jnp.dot(dec.astype(bf16), params["wp"].astype(bf16),
                   preferred_element_type=f32) + params["cp"]
    return dec, pred


if __name__ == "__main__":
    B, L, D, O = 2, 8, 32, 10   # batch, seq (segments), d_model, out_seg_num

    key = jax.random.PRNGKey(0)
    kx, kp = jax.random.split(key)
    x = jax.random.normal(kx, (B, L, D), jnp.float32)
    params = init_params(kp, D, O)
    packed = pack_params(params)          # one-time weight packing (bf16 cast)

    def run(single_buffer):
        fwd = jax.jit(functools.partial(decoder_layer_forward,
                                        tile_rows=512,
                                        single_buffer_weights=single_buffer))
        out = fwd(x, packed)
        jax.block_until_ready(out)
        return out

    try:
        dec_out, layer_pred = run(True)
    except Exception:
        # Fallback for JAX versions that reject pl.Buffered(1) on top-level
        # pallas_call BlockSpecs: keep default (double-buffered) weights.
        dec_out, layer_pred = run(False)

    assert dec_out.shape == (B, L, D)
    assert layer_pred.shape == (B, L, O)

    # Tight check against a reference mirroring the kernel's precision.
    dec_m, pred_m = _reference_matched(x, params)
    assert jnp.allclose(dec_out, dec_m, atol=5e-3, rtol=5e-3)
    assert jnp.allclose(layer_pred, pred_m, atol=5e-3, rtol=5e-3)

    # Loose check against the exact f32 / erf-GELU module semantics
    # (slack covers bf16 MXU inputs and the tanh-approx GELU).
    dec_e, pred_e = _reference_exact(x, params)
    assert jnp.allclose(dec_out, dec_e, atol=5e-2, rtol=5e-2)
    assert jnp.allclose(layer_pred, pred_e, atol=5e-2, rtol=5e-2)

    print("KERNEL_OK")
</pallas_src>

<mosaic_0001>
module attributes {stable_mosaic.version = 11 : i64} {
  func.func @_decoder_layer_kernel(%arg0: i32, %arg1: memref<16x32xf32, #tpu.memory_space<vmem>>, %arg2: memref<1x32xf32, #tpu.memory_space<vmem>>, %arg3: memref<1x32xf32, #tpu.memory_space<vmem>>, %arg4: memref<32x32xbf16, #tpu.memory_space<vmem>>, %arg5: memref<1x32xf32, #tpu.memory_space<vmem>>, %arg6: memref<32x32xbf16, #tpu.memory_space<vmem>>, %arg7: memref<1x32xf32, #tpu.memory_space<vmem>>, %arg8: memref<1x32xf32, #tpu.memory_space<vmem>>, %arg9: memref<1x32xf32, #tpu.memory_space<vmem>>, %arg10: memref<32x10xbf16, #tpu.memory_space<vmem>>, %arg11: memref<1x10xf32, #tpu.memory_space<vmem>>, %arg12: memref<16x32xf32, #tpu.memory_space<vmem>>, %arg13: memref<16x10xf32, #tpu.memory_space<vmem>>) attributes {dimension_semantics = [#tpu.dimension_semantics<parallel>], iteration_bounds = array<i64: 1>, scalar_prefetch = 0 : i64, scratch_operands = 0 : i64, tpu.core_type = #tpu.core_type<tc>, window_params = [{transform_indices = @transform_0, window_bounds = array<i64: 16, 32>}, {pipeline_mode = #tpu.pipeline_mode<synchronous>, transform_indices = @transform_1, window_bounds = array<i64: 1, 32>}, {pipeline_mode = #tpu.pipeline_mode<synchronous>, transform_indices = @transform_2, window_bounds = array<i64: 1, 32>}, {pipeline_mode = #tpu.pipeline_mode<synchronous>, transform_indices = @transform_3, window_bounds = array<i64: 32, 32>}, {pipeline_mode = #tpu.pipeline_mode<synchronous>, transform_indices = @transform_4, window_bounds = array<i64: 1, 32>}, {pipeline_mode = #tpu.pipeline_mode<synchronous>, transform_indices = @transform_5, window_bounds = array<i64: 32, 32>}, {pipeline_mode = #tpu.pipeline_mode<synchronous>, transform_indices = @transform_6, window_bounds = array<i64: 1, 32>}, {pipeline_mode = #tpu.pipeline_mode<synchronous>, transform_indices = @transform_7, window_bounds = array<i64: 1, 32>}, {pipeline_mode = #tpu.pipeline_mode<synchronous>, transform_indices = @transform_8, window_bounds = array<i64: 1, 32>}, {pipeline_mode = #tpu.pipeline_mode<synchronous>, transform_indices = @transform_9, window_bounds = array<i64: 32, 10>}, {pipeline_mode = #tpu.pipeline_mode<synchronous>, transform_indices = @transform_10, window_bounds = array<i64: 1, 10>}, {transform_indices = @transform_11, window_bounds = array<i64: 16, 32>}, {transform_indices = @transform_12, window_bounds = array<i64: 16, 10>}]} {
    %c0 = arith.constant 0 : index
    %c0_0 = arith.constant 0 : index
    %0 = vector.load %arg1[%c0, %c0_0] : memref<16x32xf32, #tpu.memory_space<vmem>>, vector<16x32xf32>
    %1 = arith.addf %0, %0 : vector<16x32xf32>
    %c0_1 = arith.constant 0 : index
    %c0_2 = arith.constant 0 : index
    %2 = vector.load %arg2[%c0_1, %c0_2] : memref<1x32xf32, #tpu.memory_space<vmem>>, vector<1x32xf32>
    %c0_3 = arith.constant 0 : index
    %c0_4 = arith.constant 0 : index
    %3 = vector.load %arg3[%c0_3, %c0_4] : memref<1x32xf32, #tpu.memory_space<vmem>>, vector<1x32xf32>
    %cst = arith.constant dense<0.000000e+00> : vector<16xf32>
    %4 = vector.multi_reduction <add>, %1, %cst [1] : vector<16x32xf32> to vector<16xf32>
    %5 = vector.shape_cast %4 : vector<16xf32> to vector<16x1xf32>
    %cst_5 = arith.constant 3.125000e-02 : f32
    %6 = vector.broadcast %cst_5 : f32 to vector<16x1xf32>
    %7 = arith.mulf %5, %6 : vector<16x1xf32>
    %8 = vector.broadcast %7 : vector<16x1xf32> to vector<16x32xf32>
    %9 = arith.subf %1, %8 : vector<16x32xf32>
    %10 = arith.mulf %9, %9 : vector<16x32xf32>
    %cst_6 = arith.constant dense<0.000000e+00> : vector<16xf32>
    %11 = vector.multi_reduction <add>, %10, %cst_6 [1] : vector<16x32xf32> to vector<16xf32>
    %12 = vector.shape_cast %11 : vector<16xf32> to vector<16x1xf32>
    %cst_7 = arith.constant 3.125000e-02 : f32
    %13 = vector.broadcast %cst_7 : f32 to vector<16x1xf32>
    %14 = arith.mulf %12, %13 : vector<16x1xf32>
    %cst_8 = arith.constant 9.99999974E-6 : f32
    %15 = vector.broadcast %cst_8 : f32 to vector<16x1xf32>
    %16 = arith.addf %14, %15 : vector<16x1xf32>
    %17 = math.rsqrt %16 : vector<16x1xf32>
    %18 = vector.broadcast %17 : vector<16x1xf32> to vector<16x32xf32>
    %19 = arith.mulf %9, %18 : vector<16x32xf32>
    %20 = vector.broadcast %2 : vector<1x32xf32> to vector<16x32xf32>
    %21 = arith.mulf %19, %20 : vector<16x32xf32>
    %22 = vector.broadcast %3 : vector<1x32xf32> to vector<16x32xf32>
    %23 = arith.addf %21, %22 : vector<16x32xf32>
    %24 = arith.truncf %23 : vector<16x32xf32> to vector<16x32xbf16>
    %c0_9 = arith.constant 0 : index
    %c0_10 = arith.constant 0 : index
    %25 = vector.load %arg4[%c0_9, %c0_10] : memref<32x32xbf16, #tpu.memory_space<vmem>>, vector<32x32xbf16>
    %cst_11 = arith.constant dense<0.000000e+00> : vector<16x32xf32>
    %26 = tpu.matmul %24, %25, %cst_11 {dimension_numbers = #tpu.dot_dimension_numbers<[1], [0], [0], [1], [0, 0, 1, 1], [], []>} : vector<16x32xbf16>, vector<32x32xbf16>, vector<16x32xf32> -> vector<16x32xf32>
    %c0_12 = arith.constant 0 : index
    %c0_13 = arith.constant 0 : index
    %27 = vector.load %arg5[%c0_12, %c0_13] : memref<1x32xf32, #tpu.memory_space<vmem>>, vector<1x32xf32>
    %28 = vector.broadcast %27 : vector<1x32xf32> to vector<16x32xf32>
    %29 = arith.addf %26, %28 : vector<16x32xf32>
    %cst_14 = arith.constant 5.000000e-01 : f32
    %30 = vector.broadcast %cst_14 : f32 to vector<16x32xf32>
    %31 = arith.mulf %30, %29 : vector<16x32xf32>
    %cst_15 = arith.constant 4.471500e-02 : f32
    %32 = vector.broadcast %cst_15 : f32 to vector<16x32xf32>
    %33 = arith.mulf %32, %29 : vector<16x32xf32>
    %34 = arith.mulf %33, %29 : vector<16x32xf32>
    %35 = arith.mulf %34, %29 : vector<16x32xf32>
    %36 = arith.addf %29, %35 : vector<16x32xf32>
    %cst_16 = arith.constant 0.797884583 : f32
    %37 = vector.broadcast %cst_16 : f32 to vector<16x32xf32>
    %38 = arith.mulf %37, %36 : vector<16x32xf32>
    %39 = math.tanh %38 : vector<16x32xf32>
    %cst_17 = arith.constant 1.000000e+00 : f32
    %40 = vector.broadcast %cst_17 : f32 to vector<16x32xf32>
    %41 = arith.addf %40, %39 : vector<16x32xf32>
    %42 = arith.mulf %31, %41 : vector<16x32xf32>
    %43 = arith.truncf %42 : vector<16x32xf32> to vector<16x32xbf16>
    %c0_18 = arith.constant 0 : index
    %c0_19 = arith.constant 0 : index
    %44 = vector.load %arg6[%c0_18, %c0_19] : memref<32x32xbf16, #tpu.memory_space<vmem>>, vector<32x32xbf16>
    %cst_20 = arith.constant dense<0.000000e+00> : vector<16x32xf32>
    %45 = tpu.matmul %43, %44, %cst_20 {dimension_numbers = #tpu.dot_dimension_numbers<[1], [0], [0], [1], [0, 0, 1, 1], [], []>} : vector<16x32xbf16>, vector<32x32xbf16>, vector<16x32xf32> -> vector<16x32xf32>
    %c0_21 = arith.constant 0 : index
    %c0_22 = arith.constant 0 : index
    %46 = vector.load %arg7[%c0_21, %c0_22] : memref<1x32xf32, #tpu.memory_space<vmem>>, vector<1x32xf32>
    %47 = vector.broadcast %46 : vector<1x32xf32> to vector<16x32xf32>
    %48 = arith.addf %45, %47 : vector<16x32xf32>
    %49 = arith.addf %23, %48 : vector<16x32xf32>
    %c0_23 = arith.constant 0 : index
    %c0_24 = arith.constant 0 : index
    %50 = vector.load %arg8[%c0_23, %c0_24] : memref<1x32xf32, #tpu.memory_space<vmem>>, vector<1x32xf32>
    %c0_25 = arith.constant 0 : index
    %c0_26 = arith.constant 0 : index
    %51 = vector.load %arg9[%c0_25, %c0_26] : memref<1x32xf32, #tpu.memory_space<vmem>>, vector<1x32xf32>
    %cst_27 = arith.constant dense<0.000000e+00> : vector<16xf32>
    %52 = vector.multi_reduction <add>, %49, %cst_27 [1] : vector<16x32xf32> to vector<16xf32>
    %53 = vector.shape_cast %52 : vector<16xf32> to vector<16x1xf32>
    %cst_28 = arith.constant 3.125000e-02 : f32
    %54 = vector.broadcast %cst_28 : f32 to vector<16x1xf32>
    %55 = arith.mulf %53, %54 : vector<16x1xf32>
    %56 = vector.broadcast %55 : vector<16x1xf32> to vector<16x32xf32>
    %57 = arith.subf %49, %56 : vector<16x32xf32>
    %58 = arith.mulf %57, %57 : vector<16x32xf32>
    %cst_29 = arith.constant dense<0.000000e+00> : vector<16xf32>
    %59 = vector.multi_reduction <add>, %58, %cst_29 [1] : vector<16x32xf32> to vector<16xf32>
    %60 = vector.shape_cast %59 : vector<16xf32> to vector<16x1xf32>
    %cst_30 = arith.constant 3.125000e-02 : f32
    %61 = vector.broadcast %cst_30 : f32 to vector<16x1xf32>
    %62 = arith.mulf %60, %61 : vector<16x1xf32>
    %cst_31 = arith.constant 9.99999974E-6 : f32
    %63 = vector.broadcast %cst_31 : f32 to vector<16x1xf32>
    %64 = arith.addf %62, %63 : vector<16x1xf32>
    %65 = math.rsqrt %64 : vector<16x1xf32>
    %66 = vector.broadcast %65 : vector<16x1xf32> to vector<16x32xf32>
    %67 = arith.mulf %57, %66 : vector<16x32xf32>
    %68 = vector.broadcast %50 : vector<1x32xf32> to vector<16x32xf32>
    %69 = arith.mulf %67, %68 : vector<16x32xf32>
    %70 = vector.broadcast %51 : vector<1x32xf32> to vector<16x32xf32>
    %71 = arith.addf %69, %70 : vector<16x32xf32>
    %c0_32 = arith.constant 0 : index
    %c0_33 = arith.constant 0 : index
    %72 = vector.load %arg12[%c0_32, %c0_33] : memref<16x32xf32, #tpu.memory_space<vmem>>, vector<16x32xf32>
    tpu.vector_store %arg12[%c0_32, %c0_33], %71 {strides = array<i32>} : memref<16x32xf32, #tpu.memory_space<vmem>>, vector<16x32xf32>,
    %73 = arith.truncf %71 : vector<16x32xf32> to vector<16x32xbf16>
    %c0_34 = arith.constant 0 : index
    %c0_35 = arith.constant 0 : index
    %74 = vector.load %arg10[%c0_34, %c0_35] : memref<32x10xbf16, #tpu.memory_space<vmem>>, vector<32x10xbf16>
    %cst_36 = arith.constant dense<0.000000e+00> : vector<16x10xf32>
    %75 = tpu.matmul %73, %74, %cst_36 {dimension_numbers = #tpu.dot_dimension_numbers<[1], [0], [0], [1], [0, 0, 1, 1], [], []>} : vector<16x32xbf16>, vector<32x10xbf16>, vector<16x10xf32> -> vector<16x10xf32>
    %c0_37 = arith.constant 0 : index
    %c0_38 = arith.constant 0 : index
    %76 = vector.load %arg11[%c0_37, %c0_38] : memref<1x10xf32, #tpu.memory_space<vmem>>, vector<1x10xf32>
    %77 = vector.broadcast %76 : vector<1x10xf32> to vector<16x10xf32>
    %78 = arith.addf %75, %77 : vector<16x10xf32>
    %c0_39 = arith.constant 0 : index
    %c0_40 = arith.constant 0 : index
    %79 = vector.load %arg13[%c0_39, %c0_40] : memref<16x10xf32, #tpu.memory_space<vmem>>, vector<16x10xf32>
    tpu.vector_store %arg13[%c0_39, %c0_40], %78 {strides = array<i32>} : memref<16x10xf32, #tpu.memory_space<vmem>>, vector<16x10xf32>,
    return
  }
  func.func @transform_0(%arg0: i32) -> (i32, i32) {
    %c0_i32 = arith.constant 0 : i32
    %c0_i32_0 = arith.constant 0 : i32
    return %arg0, %c0_i32 : i32, i32
  }
  func.func @transform_1(%arg0: i32) -> (i32, i32) {
    %c0_i32 = arith.constant 0 : i32
    %c0_i32_0 = arith.constant 0 : i32
    %c0_i32_1 = arith.constant 0 : i32
    return %c0_i32, %c0_i32_0 : i32, i32
  }
  func.func @transform_2(%arg0: i32) -> (i32, i32) {
    %c0_i32 = arith.constant 0 : i32
    %c0_i32_0 = arith.constant 0 : i32
    %c0_i32_1 = arith.constant 0 : i32
    return %c0_i32, %c0_i32_0 : i32, i32
  }
  func.func @transform_3(%arg0: i32) -> (i32, i32) {
    %c0_i32 = arith.constant 0 : i32
    %c0_i32_0 = arith.constant 0 : i32
    %c0_i32_1 = arith.constant 0 : i32
    return %c0_i32, %c0_i32_0 : i32, i32
  }
  func.func @transform_4(%arg0: i32) -> (i32, i32) {
    %c0_i32 = arith.constant 0 : i32
    %c0_i32_0 = arith.constant 0 : i32
    %c0_i32_1 = arith.constant 0 : i32
    return %c0_i32, %c0_i32_0 : i32, i32
  }
  func.func @transform_5(%arg0: i32) -> (i32, i32) {
    %c0_i32 = arith.constant 0 : i32
    %c0_i32_0 = arith.constant 0 : i32
    %c0_i32_1 = arith.constant 0 : i32
    return %c0_i32, %c0_i32_0 : i32, i32
  }
  func.func @transform_6(%arg0: i32) -> (i32, i32) {
    %c0_i32 = arith.constant 0 : i32
    %c0_i32_0 = arith.constant 0 : i32
    %c0_i32_1 = arith.constant 0 : i32
    return %c0_i32, %c0_i32_0 : i32, i32
  }
  func.func @transform_7(%arg0: i32) -> (i32, i32) {
    %c0_i32 = arith.constant 0 : i32
    %c0_i32_0 = arith.constant 0 : i32
    %c0_i32_1 = arith.constant 0 : i32
    return %c0_i32, %c0_i32_0 : i32, i32
  }
  func.func @transform_8(%arg0: i32) -> (i32, i32) {
    %c0_i32 = arith.constant 0 : i32
    %c0_i32_0 = arith.constant 0 : i32
    %c0_i32_1 = arith.constant 0 : i32
    return %c0_i32, %c0_i32_0 : i32, i32
  }
  func.func @transform_9(%arg0: i32) -> (i32, i32) {
    %c0_i32 = arith.constant 0 : i32
    %c0_i32_0 = arith.constant 0 : i32
    %c0_i32_1 = arith.constant 0 : i32
    return %c0_i32, %c0_i32_0 : i32, i32
  }
  func.func @transform_10(%arg0: i32) -> (i32, i32) {
    %c0_i32 = arith.constant 0 : i32
    %c0_i32_0 = arith.constant 0 : i32
    %c0_i32_1 = arith.constant 0 : i32
    return %c0_i32, %c0_i32_0 : i32, i32
  }
  func.func @transform_11(%arg0: i32) -> (i32, i32) {
    %c0_i32 = arith.constant 0 : i32
    %c0_i32_0 = arith.constant 0 : i32
    return %arg0, %c0_i32 : i32, i32
  }
  func.func @transform_12(%arg0: i32) -> (i32, i32) {
    %c0_i32 = arith.constant 0 : i32
    %c0_i32_0 = arith.constant 0 : i32
    return %arg0, %c0_i32 : i32, i32
  }
}

module attributes {stable_mosaic.version = 11 : i64} {
  func.func @_decoder_layer_kernel(%arg0: i32, %arg1: memref<16x32xf32, #tpu.memory_space<vmem>>, %arg2: memref<1x32xf32, #tpu.memory_space<vmem>>, %arg3: memref<1x32xf32, #tpu.memory_space<vmem>>, %arg4: memref<32x32xbf16, #tpu.memory_space<vmem>>, %arg5: memref<1x32xf32, #tpu.memory_space<vmem>>, %arg6: memref<32x32xbf16, #tpu.memory_space<vmem>>, %arg7: memref<1x32xf32, #tpu.memory_space<vmem>>, %arg8: memref<1x32xf32, #tpu.memory_space<vmem>>, %arg9: memref<1x32xf32, #tpu.memory_space<vmem>>, %arg10: memref<32x10xbf16, #tpu.memory_space<vmem>>, %arg11: memref<1x10xf32, #tpu.memory_space<vmem>>, %arg12: memref<16x32xf32, #tpu.memory_space<vmem>>, %arg13: memref<16x10xf32, #tpu.memory_space<vmem>>) attributes {dimension_semantics = [#tpu.dimension_semantics<parallel>], iteration_bounds = array<i64: 1>, scalar_prefetch = 0 : i64, scratch_operands = 0 : i64, tpu.core_type = #tpu.core_type<tc>, window_params = [{transform_indices = @transform_0, window_bounds = array<i64: 16, 32>}, {pipeline_mode = #tpu.pipeline_mode<synchronous>, transform_indices = @transform_1, window_bounds = array<i64: 1, 32>}, {pipeline_mode = #tpu.pipeline_mode<synchronous>, transform_indices = @transform_2, window_bounds = array<i64: 1, 32>}, {pipeline_mode = #tpu.pipeline_mode<synchronous>, transform_indices = @transform_3, window_bounds = array<i64: 32, 32>}, {pipeline_mode = #tpu.pipeline_mode<synchronous>, transform_indices = @transform_4, window_bounds = array<i64: 1, 32>}, {pipeline_mode = #tpu.pipeline_mode<synchronous>, transform_indices = @transform_5, window_bounds = array<i64: 32, 32>}, {pipeline_mode = #tpu.pipeline_mode<synchronous>, transform_indices = @transform_6, window_bounds = array<i64: 1, 32>}, {pipeline_mode = #tpu.pipeline_mode<synchronous>, transform_indices = @transform_7, window_bounds = array<i64: 1, 32>}, {pipeline_mode = #tpu.pipeline_mode<synchronous>, transform_indices = @transform_8, window_bounds = array<i64: 1, 32>}, {pipeline_mode = #tpu.pipeline_mode<synchronous>, transform_indices = @transform_9, window_bounds = array<i64: 32, 10>}, {pipeline_mode = #tpu.pipeline_mode<synchronous>, transform_indices = @transform_10, window_bounds = array<i64: 1, 10>}, {transform_indices = @transform_11, window_bounds = array<i64: 16, 32>}, {transform_indices = @transform_12, window_bounds = array<i64: 16, 10>}]} {
    %c0 = arith.constant 0 : index
    %c0_0 = arith.constant 0 : index
    %0 = vector.load %arg1[%c0, %c0_0] : memref<16x32xf32, #tpu.memory_space<vmem>>, vector<16x32xf32>
    %1 = arith.addf %0, %0 : vector<16x32xf32>
    %c0_1 = arith.constant 0 : index
    %c0_2 = arith.constant 0 : index
    %2 = vector.load %arg2[%c0_1, %c0_2] : memref<1x32xf32, #tpu.memory_space<vmem>>, vector<1x32xf32>
    %c0_3 = arith.constant 0 : index
    %c0_4 = arith.constant 0 : index
    %3 = vector.load %arg3[%c0_3, %c0_4] : memref<1x32xf32, #tpu.memory_space<vmem>>, vector<1x32xf32>
    %cst = arith.constant dense<0.000000e+00> : vector<16xf32>
    %4 = vector.multi_reduction <add>, %1, %cst [1] : vector<16x32xf32> to vector<16xf32>
    %5 = vector.shape_cast %4 : vector<16xf32> to vector<16x1xf32>
    %cst_5 = arith.constant 3.125000e-02 : f32
    %6 = vector.broadcast %cst_5 : f32 to vector<16x1xf32>
    %7 = arith.mulf %5, %6 : vector<16x1xf32>
    %8 = vector.broadcast %7 : vector<16x1xf32> to vector<16x32xf32>
    %9 = arith.subf %1, %8 : vector<16x32xf32>
    %10 = arith.mulf %9, %9 : vector<16x32xf32>
    %cst_6 = arith.constant dense<0.000000e+00> : vector<16xf32>
    %11 = vector.multi_reduction <add>, %10, %cst_6 [1] : vector<16x32xf32> to vector<16xf32>
    %12 = vector.shape_cast %11 : vector<16xf32> to vector<16x1xf32>
    %cst_7 = arith.constant 3.125000e-02 : f32
    %13 = vector.broadcast %cst_7 : f32 to vector<16x1xf32>
    %14 = arith.mulf %12, %13 : vector<16x1xf32>
    %cst_8 = arith.constant 9.99999974E-6 : f32
    %15 = vector.broadcast %cst_8 : f32 to vector<16x1xf32>
    %16 = arith.addf %14, %15 : vector<16x1xf32>
    %17 = math.rsqrt %16 : vector<16x1xf32>
    %18 = vector.broadcast %17 : vector<16x1xf32> to vector<16x32xf32>
    %19 = arith.mulf %9, %18 : vector<16x32xf32>
    %20 = vector.broadcast %2 : vector<1x32xf32> to vector<16x32xf32>
    %21 = arith.mulf %19, %20 : vector<16x32xf32>
    %22 = vector.broadcast %3 : vector<1x32xf32> to vector<16x32xf32>
    %23 = arith.addf %21, %22 : vector<16x32xf32>
    %24 = arith.truncf %23 : vector<16x32xf32> to vector<16x32xbf16>
    %c0_9 = arith.constant 0 : index
    %c0_10 = arith.constant 0 : index
    %25 = vector.load %arg4[%c0_9, %c0_10] : memref<32x32xbf16, #tpu.memory_space<vmem>>, vector<32x32xbf16>
    %cst_11 = arith.constant dense<0.000000e+00> : vector<16x32xf32>
    %26 = tpu.matmul %24, %25, %cst_11 {dimension_numbers = #tpu.dot_dimension_numbers<[1], [0], [0], [1], [0, 0, 1, 1], [], []>} : vector<16x32xbf16>, vector<32x32xbf16>, vector<16x32xf32> -> vector<16x32xf32>
    %c0_12 = arith.constant 0 : index
    %c0_13 = arith.constant 0 : index
    %27 = vector.load %arg5[%c0_12, %c0_13] : memref<1x32xf32, #tpu.memory_space<vmem>>, vector<1x32xf32>
    %28 = vector.broadcast %27 : vector<1x32xf32> to vector<16x32xf32>
    %29 = arith.addf %26, %28 : vector<16x32xf32>
    %cst_14 = arith.constant 5.000000e-01 : f32
    %30 = vector.broadcast %cst_14 : f32 to vector<16x32xf32>
    %31 = arith.mulf %30, %29 : vector<16x32xf32>
    %cst_15 = arith.constant 4.471500e-02 : f32
    %32 = vector.broadcast %cst_15 : f32 to vector<16x32xf32>
    %33 = arith.mulf %32, %29 : vector<16x32xf32>
    %34 = arith.mulf %33, %29 : vector<16x32xf32>
    %35 = arith.mulf %34, %29 : vector<16x32xf32>
    %36 = arith.addf %29, %35 : vector<16x32xf32>
    %cst_16 = arith.constant 0.797884583 : f32
    %37 = vector.broadcast %cst_16 : f32 to vector<16x32xf32>
    %38 = arith.mulf %37, %36 : vector<16x32xf32>
    %39 = math.tanh %38 : vector<16x32xf32>
    %cst_17 = arith.constant 1.000000e+00 : f32
    %40 = vector.broadcast %cst_17 : f32 to vector<16x32xf32>
    %41 = arith.addf %40, %39 : vector<16x32xf32>
    %42 = arith.mulf %31, %41 : vector<16x32xf32>
    %43 = arith.truncf %42 : vector<16x32xf32> to vector<16x32xbf16>
    %c0_18 = arith.constant 0 : index
    %c0_19 = arith.constant 0 : index
    %44 = vector.load %arg6[%c0_18, %c0_19] : memref<32x32xbf16, #tpu.memory_space<vmem>>, vector<32x32xbf16>
    %cst_20 = arith.constant dense<0.000000e+00> : vector<16x32xf32>
    %45 = tpu.matmul %43, %44, %cst_20 {dimension_numbers = #tpu.dot_dimension_numbers<[1], [0], [0], [1], [0, 0, 1, 1], [], []>} : vector<16x32xbf16>, vector<32x32xbf16>, vector<16x32xf32> -> vector<16x32xf32>
    %c0_21 = arith.constant 0 : index
    %c0_22 = arith.constant 0 : index
    %46 = vector.load %arg7[%c0_21, %c0_22] : memref<1x32xf32, #tpu.memory_space<vmem>>, vector<1x32xf32>
    %47 = vector.broadcast %46 : vector<1x32xf32> to vector<16x32xf32>
    %48 = arith.addf %45, %47 : vector<16x32xf32>
    %49 = arith.addf %23, %48 : vector<16x32xf32>
    %c0_23 = arith.constant 0 : index
    %c0_24 = arith.constant 0 : index
    %50 = vector.load %arg8[%c0_23, %c0_24] : memref<1x32xf32, #tpu.memory_space<vmem>>, vector<1x32xf32>
    %c0_25 = arith.constant 0 : index
    %c0_26 = arith.constant 0 : index
    %51 = vector.load %arg9[%c0_25, %c0_26] : memref<1x32xf32, #tpu.memory_space<vmem>>, vector<1x32xf32>
    %cst_27 = arith.constant dense<0.000000e+00> : vector<16xf32>
    %52 = vector.multi_reduction <add>, %49, %cst_27 [1] : vector<16x32xf32> to vector<16xf32>
    %53 = vector.shape_cast %52 : vector<16xf32> to vector<16x1xf32>
    %cst_28 = arith.constant 3.125000e-02 : f32
    %54 = vector.broadcast %cst_28 : f32 to vector<16x1xf32>
    %55 = arith.mulf %53, %54 : vector<16x1xf32>
    %56 = vector.broadcast %55 : vector<16x1xf32> to vector<16x32xf32>
    %57 = arith.subf %49, %56 : vector<16x32xf32>
    %58 = arith.mulf %57, %57 : vector<16x32xf32>
    %cst_29 = arith.constant dense<0.000000e+00> : vector<16xf32>
    %59 = vector.multi_reduction <add>, %58, %cst_29 [1] : vector<16x32xf32> to vector<16xf32>
    %60 = vector.shape_cast %59 : vector<16xf32> to vector<16x1xf32>
    %cst_30 = arith.constant 3.125000e-02 : f32
    %61 = vector.broadcast %cst_30 : f32 to vector<16x1xf32>
    %62 = arith.mulf %60, %61 : vector<16x1xf32>
    %cst_31 = arith.constant 9.99999974E-6 : f32
    %63 = vector.broadcast %cst_31 : f32 to vector<16x1xf32>
    %64 = arith.addf %62, %63 : vector<16x1xf32>
    %65 = math.rsqrt %64 : vector<16x1xf32>
    %66 = vector.broadcast %65 : vector<16x1xf32> to vector<16x32xf32>
    %67 = arith.mulf %57, %66 : vector<16x32xf32>
    %68 = vector.broadcast %50 : vector<1x32xf32> to vector<16x32xf32>
    %69 = arith.mulf %67, %68 : vector<16x32xf32>
    %70 = vector.broadcast %51 : vector<1x32xf32> to vector<16x32xf32>
    %71 = arith.addf %69, %70 : vector<16x32xf32>
    %c0_32 = arith.constant 0 : index
    %c0_33 = arith.constant 0 : index
    %72 = vector.load %arg12[%c0_32, %c0_33] : memref<16x32xf32, #tpu.memory_space<vmem>>, vector<16x32xf32>
    tpu.vector_store %arg12[%c0_32, %c0_33], %71 {strides = array<i32>} : memref<16x32xf32, #tpu.memory_space<vmem>>, vector<16x32xf32>,
    %73 = arith.truncf %71 : vector<16x32xf32> to vector<16x32xbf16>
    %c0_34 = arith.constant 0 : index
    %c0_35 = arith.constant 0 : index
    %74 = vector.load %arg10[%c0_34, %c0_35] : memref<32x10xbf16, #tpu.memory_space<vmem>>, vector<32x10xbf16>
    %cst_36 = arith.constant dense<0.000000e+00> : vector<16x10xf32>
    %75 = tpu.matmul %73, %74, %cst_36 {dimension_numbers = #tpu.dot_dimension_numbers<[1], [0], [0], [1], [0, 0, 1, 1], [], []>} : vector<16x32xbf16>, vector<32x10xbf16>, vector<16x10xf32> -> vector<16x10xf32>
    %c0_37 = arith.constant 0 : index
    %c0_38 = arith.constant 0 : index
    %76 = vector.load %arg11[%c0_37, %c0_38] : memref<1x10xf32, #tpu.memory_space<vmem>>, vector<1x10xf32>
    %77 = vector.broadcast %76 : vector<1x10xf32> to vector<16x10xf32>
    %78 = arith.addf %75, %77 : vector<16x10xf32>
    %c0_39 = arith.constant 0 : index
    %c0_40 = arith.constant 0 : index
    %79 = vector.load %arg13[%c0_39, %c0_40] : memref<16x10xf32, #tpu.memory_space<vmem>>, vector<16x10xf32>
    tpu.vector_store %arg13[%c0_39, %c0_40], %78 {strides = array<i32>} : memref<16x10xf32, #tpu.memory_space<vmem>>, vector<16x10xf32>,
    return
  }
  func.func @transform_0(%arg0: i32) -> (i32, i32) {
    %c0_i32 = arith.constant 0 : i32
    %c0_i32_0 = arith.constant 0 : i32
    return %arg0, %c0_i32 : i32, i32
  }
  func.func @transform_1(%arg0: i32) -> (i32, i32) {
    %c0_i32 = arith.constant 0 : i32
    %c0_i32_0 = arith.constant 0 : i32
    %c0_i32_1 = arith.constant 0 : i32
    return %c0_i32, %c0_i32_0 : i32, i32
  }
  func.func @transform_2(%arg0: i32) -> (i32, i32) {
    %c0_i32 = arith.constant 0 : i32
    %c0_i32_0 = arith.constant 0 : i32
    %c0_i32_1 = arith.constant 0 : i32
    return %c0_i32, %c0_i32_0 : i32, i32
  }
  func.func @transform_3(%arg0: i32) -> (i32, i32) {
    %c0_i32 = arith.constant 0 : i32
    %c0_i32_0 = arith.constant 0 : i32
    %c0_i32_1 = arith.constant 0 : i32
    return %c0_i32, %c0_i32_0 : i32, i32
  }
  func.func @transform_4(%arg0: i32) -> (i32, i32) {
    %c0_i32 = arith.constant 0 : i32
    %c0_i32_0 = arith.constant 0 : i32
    %c0_i32_1 = arith.constant 0 : i32
    return %c0_i32, %c0_i32_0 : i32, i32
  }
  func.func @transform_5(%arg0: i32) -> (i32, i32) {
    %c0_i32 = arith.constant 0 : i32
    %c0_i32_0 = arith.constant 0 : i32
    %c0_i32_1 = arith.constant 0 : i32
    return %c0_i32, %c0_i32_0 : i32, i32
  }
  func.func @transform_6(%arg0: i32) -> (i32, i32) {
    %c0_i32 = arith.constant 0 : i32
    %c0_i32_0 = arith.constant 0 : i32
    %c0_i32_1 = arith.constant 0 : i32
    return %c0_i32, %c0_i32_0 : i32, i32
  }
  func.func @transform_7(%arg0: i32) -> (i32, i32) {
    %c0_i32 = arith.constant 0 : i32
    %c0_i32_0 = arith.constant 0 : i32
    %c0_i32_1 = arith.constant 0 : i32
    return %c0_i32, %c0_i32_0 : i32, i32
  }
  func.func @transform_8(%arg0: i32) -> (i32, i32) {
    %c0_i32 = arith.constant 0 : i32
    %c0_i32_0 = arith.constant 0 : i32
    %c0_i32_1 = arith.constant 0 : i32
    return %c0_i32, %c0_i32_0 : i32, i32
  }
  func.func @transform_9(%arg0: i32) -> (i32, i32) {
    %c0_i32 = arith.constant 0 : i32
    %c0_i32_0 = arith.constant 0 : i32
    %c0_i32_1 = arith.constant 0 : i32
    return %c0_i32, %c0_i32_0 : i32, i32
  }
  func.func @transform_10(%arg0: i32) -> (i32, i32) {
    %c0_i32 = arith.constant 0 : i32
    %c0_i32_0 = arith.constant 0 : i32
    %c0_i32_1 = arith.constant 0 : i32
    return %c0_i32, %c0_i32_0 : i32, i32
  }
  func.func @transform_11(%arg0: i32) -> (i32, i32) {
    %c0_i32 = arith.constant 0 : i32
    %c0_i32_0 = arith.constant 0 : i32
    return %arg0, %c0_i32 : i32, i32
  }
  func.func @transform_12(%arg0: i32) -> (i32, i32) {
    %c0_i32 = arith.constant 0 : i32
    %c0_i32_0 = arith.constant 0 : i32
    return %arg0, %c0_i32 : i32, i32
  }
}

</mosaic_0001>

<bundles_post_ra>
// kernel: decoder_layer_forward.1
= control target key start
LH: loop header
LB: loop body
LE: loop exit
PB: predicated region body
PF: predicated region fallthrough
CT: control target
= control target key end

     0   :  { %18 = vsyncpa [#allocation3], 0  ;;  %s948_s0 = inlined_call_operand.vmem [shape: f32[16,32], index: 0, kind: input, shape index: {}]   ;;  %s949_s1 = inlined_call_operand.hbm [shape: f32[1,32], index: 1, kind: input, shape index: {}]   ;;  %s950_s2 = inlined_call_operand.hbm [shape: f32[1,32], index: 2, kind: input, shape index: {}]   ;;  %s951_s3 = inlined_call_operand.vmem [shape: bf16[32,32], index: 3, kind: input, shape index: {}]   ;;  %s952_s4 = inlined_call_operand.hbm [shape: f32[1,32], index: 4, kind: input, shape index: {}]   ;;  %s953_s5 = inlined_call_operand.hbm [shape: bf16[32,32], index: 5, kind: input, shape index: {}]   ;;  %s954_s6 = inlined_call_operand.hbm [shape: f32[1,32], index: 6, kind: input, shape index: {}]   ;;  %s955_s7 = inlined_call_operand.hbm [shape: f32[1,32], index: 7, kind: input, shape index: {}]   ;;  %s956_s8 = inlined_call_operand.hbm [shape: f32[1,32], index: 8, kind: input, shape index: {}]   ;;  %s957_s9 = inlined_call_operand.vmem [shape: bf16[32,10], index: 9, kind: input, shape index: {}]   ;;  %s958_s10 = inlined_call_operand.hbm [shape: f32[1,10], index: 10, kind: input, shape index: {}]   ;;  %s959_s11 = inlined_call_operand.hbm [shape: f32[16,32], index: 11, kind: output, shape index: {0}]   ;;  %s960_s12 = inlined_call_operand.hbm [shape: f32[16,10], index: 12, kind: output, shape index: {1}]  }
   0x1   :  { %19 = vsyncpa [#allocation6], 0 }
   0x2   :  { %20 = vsyncpa [#allocation9], 0 }
   0x3   :  { %21 = vsyncpa [#allocation12], 0 }
   0x4   :  { %22 = vsyncpa [#allocation15], 0 }
   0x5   :  { %23 = vsyncpa [#allocation4], 0 }
   0x6   :  { %24 = vsyncpa [#allocation18], 0  ;;  %s794_s21 = smov [#allocation5]   ;;  %s795_s23 = smov [#allocation8]  }
   0x7   :  { %s43_s22 = sshll.u32 %s794_s21, 4  ;;  %s64_s24 = sshll.u32 %s795_s23, 4  ;;  %s44_s22 = int_to_ptr.vmem [resolvable:$true] %s43_s22  ;;  %s65_s24 = int_to_ptr.vmem [resolvable:$true] %s64_s24 }
   0x8   :  { %s588_s25 = scalar_lea.vmem %s44_s22, 16  ;;  %s592_s26 = scalar_lea.vmem %s44_s22, 32 }
   0x9   :  { %p589_p0 = scmp.ne.s32.totalorder %s44_s22, %s588_s25  ;;  %p593_p1 = scmp.lt.s32.totalorder %s44_s22, %s44_s22 }
   0xa   :  { %p594_p2 = scmp.lt.s32.totalorder %s592_s26, %s588_s25 }
   0xc   :  { %p595_p3 = por %p594_p2, %p593_p1 }
   0xe   :  { %p596_p4 = pnand %p595_p3, %p589_p0 }
  0x10   :  { %599 = shalt.err (!%p596_p4)
}
  0x11   :  { %46 = dma.hbm_to_vmem [thread:$0]  %s950_s2, 16, %s44_s22, [#allocation6]  }
  0x12   :  { %s608_s29 = scalar_lea.vmem %s65_s24, 256  ;;  %p613_p6 = scmp.lt.s32.totalorder %s65_s24, %s65_s24 }
  0x13   :  { %p609_p5 = scmp.ne.s32.totalorder %s65_s24, %s608_s29  ;;  %p614_p7 = scmp.lt.s32.totalorder %s608_s29, %s608_s29 }
  0x15   :  { %p615_p8 = por %p614_p7, %p613_p6 }
  0x17   :  { %p616_p9 = pnand %p615_p8, %p609_p5 }
  0x19   :  { %619 = shalt.err (!%p616_p9)
}
  0x1a   :  { %s796_s30 = smov 64   ;;  %s797_s13 = smov 4  }
  0x1b   :  { %70 = dma.hbm_to_vmem [thread:$0]  %s953_s5, 256, %s65_s24, [#allocation9], %s796_s30, %s796_s30, %s797_s13  }
  0x1c   :  { %s798_s16 = smov [#allocation11]   ;;  %s799_s18 = smov [#allocation2]  }
  0x1d   :  { %s87_s17 = sshll.u32 %s798_s16, 4  ;;  %s33_s19 = sshll.u32 %s799_s18, 4  ;;  %s88_s17 = int_to_ptr.vmem [resolvable:$true] %s87_s17  ;;  %s34_s19 = int_to_ptr.vmem [resolvable:$true] %s33_s19 }
  0x1e   :  { %s628_s2 = scalar_lea.vmem %s88_s17, 16  ;;  %s632_s20 = scalar_lea.vmem %s88_s17, 32 }
  0x1f   :  { %p629_p10 = scmp.ne.s32.totalorder %s88_s17, %s628_s2  ;;  %p633_p11 = scmp.lt.s32.totalorder %s88_s17, %s88_s17 }
  0x20   :  { %p634_p12 = scmp.lt.s32.totalorder %s632_s20, %s628_s2 }
  0x22   :  { %p635_p13 = por %p634_p12, %p633_p11 }
  0x24   :  { %p636_p0 = pnand %p635_p13, %p629_p10 }
  0x26   :  { %639 = shalt.err (!%p636_p0)
}
  0x27   :  { %90 = dma.hbm_to_vmem [thread:$0]  %s955_s7, 16, %s88_s17, [#allocation12]  }
  0x28   :  { %s648_s23 = scalar_lea.vmem %s34_s19, 16  ;;  %s652_s5 = scalar_lea.vmem %s34_s19, 32 }
  0x29   :  { %p649_p1 = scmp.ne.s32.totalorder %s34_s19, %s648_s23  ;;  %p653_p2 = scmp.lt.s32.totalorder %s34_s19, %s34_s19 }
  0x2a   :  { %p654_p3 = scmp.lt.s32.totalorder %s652_s5, %s648_s23 }
  0x2c   :  { %p655_p4 = por %p654_p3, %p653_p2 }
  0x2e   :  { %p656_p5 = pnand %p655_p4, %p649_p1 }
  0x30   :  { %659 = shalt.err (!%p656_p5)
}
  0x31   :  { %36 = dma.hbm_to_vmem [thread:$0]  %s949_s1, 16, %s34_s19, [#allocation3]  }
  0x32   :  { %s800_s26 = smov [#allocation7]   ;;  %s801_s28 = smov [#allocation10]  }
  0x33   :  { %s55_s27 = sshll.u32 %s800_s26, 4  ;;  %s77_s29 = sshll.u32 %s801_s28, 4  ;;  %s56_s27 = int_to_ptr.vmem [resolvable:$true] %s55_s27  ;;  %s78_s29 = int_to_ptr.vmem [resolvable:$true] %s77_s29 }
  0x34   :  { %s668_s30 = scalar_lea.vmem %s56_s27, 16  ;;  %s672_s7 = scalar_lea.vmem %s56_s27, 32 }
  0x35   :  { %p669_p6 = scmp.ne.s32.totalorder %s56_s27, %s668_s30  ;;  %p673_p7 = scmp.lt.s32.totalorder %s56_s27, %s56_s27 }
  0x36   :  { %p674_p8 = scmp.lt.s32.totalorder %s672_s7, %s668_s30 }
  0x38   :  { %p675_p9 = por %p674_p8, %p673_p7 }
  0x3a   :  { %p676_p10 = pnand %p675_p9, %p669_p6 }
  0x3c   :  { %679 = shalt.err (!%p676_p10)
}
  0x3d   :  { %58 = dma.hbm_to_vmem [thread:$0]  %s952_s4, 16, %s56_s27, [#allocation6]  }
  0x3e   :  { %s688_s15 = scalar_lea.vmem %s78_s29, 16  ;;  %s692_s1 = scalar_lea.vmem %s78_s29, 32 }
  0x3f   :  { %p689_p11 = scmp.ne.s32.totalorder %s78_s29, %s688_s15  ;;  %p693_p12 = scmp.lt.s32.totalorder %s78_s29, %s78_s29 }
  0x40   :  { %p694_p13 = scmp.lt.s32.totalorder %s692_s1, %s688_s15 }
  0x42   :  { %p695_p0 = por %p694_p13, %p693_p12 }
  0x44   :  { %p696_p1 = pnand %p695_p0, %p689_p11 }
  0x46   :  { %699 = shalt.err (!%p696_p1)
}
  0x47   :  { %80 = dma.hbm_to_vmem [thread:$0]  %s954_s6, 16, %s78_s29, [#allocation9]  }
  0x48   :  { %s802_s18 = smov [#allocation13]   ;;  %s803_s2 = smov [#allocation14]  }
  0x49   :  { %s97_s19 = sshll.u32 %s802_s18, 4  ;;  %s109_s20 = sshll.u32 %s803_s2, 4  ;;  %s98_s19 = int_to_ptr.vmem [resolvable:$true] %s97_s19  ;;  %s110_s20 = int_to_ptr.vmem [resolvable:$true] %s109_s20 }
  0x4a   :  { %s708_s21 = scalar_lea.vmem %s98_s19, 16  ;;  %s712_s4 = scalar_lea.vmem %s98_s19, 32 }
  0x4b   :  { %p709_p2 = scmp.ne.s32.totalorder %s98_s19, %s708_s21  ;;  %p713_p3 = scmp.lt.s32.totalorder %s98_s19, %s98_s19 }
  0x4c   :  { %p714_p4 = scmp.lt.s32.totalorder %s712_s4, %s708_s21 }
  0x4e   :  { %p715_p5 = por %p714_p4, %p713_p3 }
  0x50   :  { %p716_p6 = pnand %p715_p5, %p709_p2 }
  0x52   :  { %719 = shalt.err (!%p716_p6)
}
  0x53   :  { %100 = dma.hbm_to_vmem [thread:$0]  %s956_s8, 16, %s98_s19, [#allocation12]  }
  0x54   :  { %s728_s5 = scalar_lea.vmem %s110_s20, 16  ;;  %s732_s6 = scalar_lea.vmem %s110_s20, 32 }
  0x55   :  { %p729_p7 = scmp.ne.s32.totalorder %s110_s20, %s728_s5  ;;  %p733_p8 = scmp.lt.s32.totalorder %s110_s20, %s110_s20 }
  0x56   :  { %p734_p9 = scmp.lt.s32.totalorder %s732_s6, %s728_s5 }
  0x58   :  { %p735_p10 = por %p734_p9, %p733_p8 }
  0x5a   :  { %p736_p11 = pnand %p735_p10, %p729_p7 }
  0x5c   :  { %739 = shalt.err (!%p736_p11)
}
  0x5d   :  { %112 = dma.hbm_to_vmem [thread:$0]  %s958_s10, 16, %s110_s20, [#allocation15]  }
  0x5e   :  { %780 = dma.done.wait [#allocation3], 16  }
  0x5f   :  { %781 = vsyncadd [#allocation3], 4294967280 }
  0x60   :  { %782 = dma.done.wait [#allocation6], 32  }
  0x61   :  { %783 = vsyncadd [#allocation6], 4294967264 }
  0x62   :  { %784 = dma.done.wait [#allocation9], 272  }
  0x63   :  { %785 = vsyncadd [#allocation9], 4294967024 }
  0x64   :  { %786 = dma.done.wait [#allocation12], 32  }
  0x65   :  { %787 = vsyncadd [#allocation12], 4294967264 }
  0x66   :  { %788 = dma.done.wait [#allocation15], 16  }
  0x67   :  { %789 = vsyncadd [#allocation15], 4294967280  ;;  %v138_v0 = vld [vmem:[%s948_s0] sm:$0xff]  ;;  %vm144_vm0 = vcmask 261120   ;;  %v139_v1 = vld [vmem:[%s948_s0 + $0x8] sm:$0xff]  ;;  %v804_v17 = vmov 0.0  }
  0x68   :  { %v140_v2 = vadd.f32 %v138_v0, %v138_v0  ;;  %v141_v3 = vadd.f32 %v139_v1, %v139_v1  ;;  %v562_v16 = vld [vmem:[%s951_s3 + $0x8] sm:$0xff]   ;;  %522 = vmatprep.subr.bf16.mxu0 %v804_v17  ;;  %vm805_vm1 = vmmov 0   ;;  %v563_v18 = vld [vmem:[%s951_s3] sm:$0xff]   ;;  %530 = vmatprep.subr.bf16.mxu1 %v804_v17  ;;  %v503_v0 = vld [vmem:[#allocation10] ss:$0 sm:$0xff] }
  0x69   :  { %526 = vmatprep.mubr.msk.bf16.mxu0 %vm805_vm1, %v804_v17  ;;  %523 = vmatpush3.bf16.msra.mxu0 %v562_v16  ;;  %v497_v27 = vld [vmem:[#allocation2] ss:$0 sm:$0xff]  ;;  %v498_v31 = vld [vmem:[#allocation5] ss:$0 sm:$0xff]  ;;  %v564_v36 = vld [vmem:[#allocation8 + $0x8] sm:$0xff]  }
  0x6a   :  { %v145_v4 = vsel %vm144_vm0, %v140_v2, 0.0  ;;  %v148_v5 = vsel %vm144_vm0, %v141_v3, 0.0  ;;  %524 = vmatprep.subr.bf16.mxu0 %v804_v17  ;;  %534 = vmatprep.mubr.msk.bf16.mxu1 %vm805_vm1, %v804_v17  ;;  %v565_v37 = vld [vmem:[#allocation8] sm:$0xff]   ;;  %v499_v38 = vld [vmem:[#allocation7] ss:$0 sm:$0xff] }
  0x6b   :  { %146 = vadd.xlane.f32.xlu0 %v145_v4  ;;  %531 = vmatpush3.bf16.msra.mxu1 %v564_v36 }
  0x6c   :  { %532 = vmatprep.subr.bf16.mxu1 %v804_v17 }
  0x6d   :  { %525 = vmatpush3.bf16.msra.mxu0 %v563_v18 }
  0x6e   :  { %538 = vmatprep.subr.bf16.mxu0 %v804_v17 }
  0x6f   :  { %149 = vadd.xlane.f32.xlu0 %v148_v5  ;;  %533 = vmatpush3.bf16.msra.mxu1 %v565_v37 }
  0xf4   :  { %v147_v6 = vpop.xlane.xlu0 %146 }
  0xf5   :  { %v151_v7 = vmul.f32 0.03125, %v147_v6 }
  0xf7   :  { %v153_v8 = vsub.f32 %v140_v2, %v151_v7 }
  0xf8   :  { %v150_v9 = vpop.xlane.xlu0 %149 }
  0xf9   :  { %v152_v10 = vmul.f32 0.03125, %v150_v9  ;;  %v155_v11 = vmul.f32 %v153_v8, %v153_v8 }
  0xfb   :  { %v154_v12 = vsub.f32 %v141_v3, %v152_v10  ;;  %v157_v13 = vsel %vm144_vm0, %v155_v11, 0.0 }
  0xfc   :  { %158 = vadd.xlane.f32.xlu1 %v157_v13 }
  0xfd   :  { %v156_v14 = vmul.f32 %v154_v12, %v154_v12 }
  0xff   :  { %v160_v15 = vsel %vm144_vm0, %v156_v14, 0.0 }
 0x100   :  { %161 = vadd.xlane.f32.xlu1 %v160_v15 }
 0x185   :  { %v159_v19 = vpop.xlane.xlu1 %158 }
 0x186   :  { %v163_v20 = vmul.f32 0.03125, %v159_v19 }
 0x188   :  { %v165_v21 = vadd.f32 1e-05, %v163_v20 }
 0x189   :  { %v162_v22 = vpop.xlane.xlu1 %161 }
 0x18a   :  { %568 = vrsqrt.f32 %v165_v21  ;;  %v164_v23 = vmul.f32 0.03125, %v162_v22  ;;  %v566_v22 = vld [vmem:[%s957_s9 + $0x8] sm:$0xff]  }
 0x18c   :  { %v166_v24 = vadd.f32 1e-05, %v164_v23  ;;  %v567_v23 = vld [vmem:[%s957_s9] sm:$0xff]   ;;  %s806_s9 = smov [#allocation16]  }
 0x18d   :  { %s465_s15 = sshll.u32 %s806_s9, 4  ;;  %s466_s15 = int_to_ptr.vmem [resolvable:$true] %s465_s15 }
 0x18e   :  { %570 = vrsqrt.f32 %v166_v24  ;;  %s740_s1 = scalar_lea.vmem %s466_s15, 256  ;;  %p745_p13 = scmp.lt.s32.totalorder %s466_s15, %s466_s15 }
 0x18f   :  { %p741_p12 = scmp.ne.s32.totalorder %s466_s15, %s740_s1  ;;  %p746_p0 = scmp.lt.s32.totalorder %s740_s1, %s740_s1 }
 0x191   :  { %p747_p1 = por %p746_p0, %p745_p13 }
 0x193   :  { %p748_p2 = pnand %p747_p1, %p741_p12 }
 0x197   :  { %v569_v25 = vpop.eup %568 }
 0x198   :  { %v169_v26 = vmul.f32 %v569_v25, %v153_v8 }
 0x19a   :  { %v177_v30 = vmul.f32 %v497_v27, %v169_v26 }
 0x19b   :  { %v571_v28 = vpop.eup %570 }
 0x19c   :  { %v170_v29 = vmul.f32 %v571_v28, %v154_v12  ;;  %v185_v33 = vadd.f32 %v498_v31, %v177_v30 }
 0x19e   :  { %v178_v32 = vmul.f32 %v497_v27, %v170_v29 }
 0x1a0   :  { %v186_v34 = vadd.f32 %v498_v31, %v178_v32  ;;  %v507_v31 = vld [vmem:[#allocation11] ss:$0 sm:$0xff] }
 0x1a2   :  { %v187_v35 = vpack.c.bf16 %v186_v34, %v185_v33 }
 0x1a4   :  { %527 = vmatmul.mubr.msk.bf16.vlgmr.msra.gmra.mxu0 %vm144_vm0, %v187_v35 }
 0x1a5   :  { %542 = vmatprep.mubr.msk.bf16.mxu0 %vm805_vm1, %v804_v17  ;;  %539 = vmatpush3.bf16.msra.mxu0 %v566_v22 }
 0x1a6   :  { %540 = vmatprep.subr.bf16.mxu0 %v804_v17 }
 0x1a9   :  { %541 = vmatpush3.bf16.msra.mxu0 %v567_v23 }
 0x264   :  { %v248_v39 = vpop.f32.mrf.mxu0 }
 0x265   :  { %v249_v40 = vadd.f32 %v499_v38, %v248_v39 }
 0x266   :  { %v528_v41 = vpop.f32.mrf.mxu0 }
 0x267   :  { %v257_v42 = vmul.f32 0.044715, %v249_v40  ;;  %v255_v58 = vmul.f32 0.5, %v249_v40 }
 0x268   :  { %v251_v43 = vpop.f32.mrf.mxu0 }
 0x269   :  { %v259_v44 = vmul.f32 %v257_v42, %v249_v40  ;;  %v252_v45 = vadd.f32 %v499_v38, %v251_v43 }
 0x26a   :  { %v529_v46 = vpop.f32.mrf.mxu0 }
 0x26b   :  { %v261_v47 = vmul.f32 %v259_v44, %v249_v40  ;;  %v258_v48 = vmul.f32 0.044715, %v252_v45  ;;  %v256_v59 = vmul.f32 0.5, %v252_v45 }
 0x26d   :  { %v263_v49 = vadd.f32 %v261_v47, %v249_v40  ;;  %v260_v50 = vmul.f32 %v258_v48, %v252_v45 }
 0x26f   :  { %v265_v51 = vmul.f32 0.7978846, %v263_v49  ;;  %v262_v52 = vmul.f32 %v260_v50, %v252_v45 }
 0x271   :  { %572 = vtanh.f32 %v265_v51  ;;  %v264_v53 = vadd.f32 %v262_v52, %v252_v45 }
 0x273   :  { %v266_v54 = vmul.f32 0.7978846, %v264_v53 }
 0x275   :  { %574 = vtanh.f32 %v266_v54 }
 0x27e   :  { %v573_v55 = vpop.eup %572 }
 0x27f   :  { %v269_v56 = vadd.f32 1.0, %v573_v55 }
 0x281   :  { %v271_v61 = vmul.f32 %v269_v56, %v255_v58 }
 0x282   :  { %v575_v57 = vpop.eup %574 }
 0x283   :  { %v270_v60 = vadd.f32 1.0, %v575_v57 }
 0x285   :  { %v272_v62 = vmul.f32 %v270_v60, %v256_v59 }
 0x287   :  { %v273_v63 = vpack.c.bf16 %v272_v62, %v271_v61 }
 0x289   :  { %535 = vmatmul.mubr.msk.bf16.vlgmr.msra.gmra.mxu1 %vm144_vm0, %v273_v63 }
 0x349   :  { %v334_v1 = vpop.f32.mrf.mxu1 }
 0x34a   :  { %v335_v2 = vadd.f32 %v503_v0, %v334_v1 }
 0x34b   :  { %v536_v3 = vpop.f32.mrf.mxu1 }
 0x34c   :  { %v341_v4 = vadd.f32 %v335_v2, %v185_v33  ;;  %v508_v33 = vld [vmem:[#allocation13] ss:$0 sm:$0xff] }
 0x34d   :  { %v337_v5 = vpop.f32.mrf.mxu1 }
 0x34e   :  { %v338_v6 = vadd.f32 %v503_v0, %v337_v5  ;;  %v345_v7 = vsel %vm144_vm0, %v341_v4, 0.0 }
 0x34f   :  { %346 = vadd.xlane.f32.xlu0 %v345_v7  ;;  %v537_v8 = vpop.f32.mrf.mxu1 }
 0x350   :  { %v342_v9 = vadd.f32 %v338_v6, %v186_v34 }
 0x352   :  { %v348_v10 = vsel %vm144_vm0, %v342_v9, 0.0 }
 0x353   :  { %349 = vadd.xlane.f32.xlu1 %v348_v10 }
 0x3d8   :  { %v347_v11 = vpop.xlane.xlu0 %346 }
 0x3d9   :  { %v351_v12 = vmul.f32 0.03125, %v347_v11 }
 0x3db   :  { %v353_v13 = vsub.f32 %v341_v4, %v351_v12 }
 0x3dc   :  { %v350_v14 = vpop.xlane.xlu1 %349 }
 0x3dd   :  { %v352_v15 = vmul.f32 0.03125, %v350_v14  ;;  %v355_v16 = vmul.f32 %v353_v13, %v353_v13 }
 0x3df   :  { %v354_v18 = vsub.f32 %v342_v9, %v352_v15  ;;  %v357_v19 = vsel %vm144_vm0, %v355_v16, 0.0 }
 0x3e0   :  { %358 = vadd.xlane.f32.xlu0 %v357_v19 }
 0x3e1   :  { %v356_v20 = vmul.f32 %v354_v18, %v354_v18 }
 0x3e3   :  { %v360_v21 = vsel %vm144_vm0, %v356_v20, 0.0 }
 0x3e4   :  { %361 = vadd.xlane.f32.xlu1 %v360_v21 }
 0x469   :  { %v359_v24 = vpop.xlane.xlu0 %358 }
 0x46a   :  { %v363_v25 = vmul.f32 0.03125, %v359_v24 }
 0x46c   :  { %v365_v26 = vadd.f32 1e-05, %v363_v25 }
 0x46d   :  { %v362_v27 = vpop.xlane.xlu1 %361 }
 0x46e   :  { %576 = vrsqrt.f32 %v365_v26  ;;  %v364_v28 = vmul.f32 0.03125, %v362_v27 }
 0x470   :  { %v366_v29 = vadd.f32 1e-05, %v364_v28 }
 0x472   :  { %578 = vrsqrt.f32 %v366_v29 }
 0x47b   :  { %v577_v30 = vpop.eup %576 }
 0x47c   :  { %v369_v32 = vmul.f32 %v577_v30, %v353_v13 }
 0x47e   :  { %v377_v34 = vmul.f32 %v507_v31, %v369_v32 }
 0x47f   :  { %v579_v35 = vpop.eup %578 }
 0x480   :  { %v370_v36 = vmul.f32 %v579_v35, %v354_v18  ;;  %v385_v37 = vadd.f32 %v508_v33, %v377_v34 }
 0x482   :  { %v378_v38 = vmul.f32 %v507_v31, %v370_v36  ;;  %387 = vst.msk [vmem:[#allocation16] sm:$0xff] %vm144_vm0, %v385_v37 }
 0x484   :  { %v386_v17 = vadd.f32 %v508_v33, %v378_v38 }
 0x486   :  { %v389_v39 = vpack.c.bf16 %v386_v17, %v385_v37  ;;  %388 = vst.msk [vmem:[#allocation16 + $0x8] sm:$0xff] %vm144_vm0, %v386_v17 }
 0x488   :  { %543 = vmatmul.mubr.msk.bf16.vlgmr.msra.gmra.mxu0 %vm144_vm0, %v389_v39 }
 0x489   :  { %751 = shalt.err (!%p748_p2)
}
 0x48a   :  { %s807_s16 = smov 128   ;;  %s808_s17 = smov 8   ;;  %v509_v40 = vld [vmem:[#allocation14] ss:$0 sm:$0xff]  ;;  %vm457_vm2 = vcmask 80896  }
 0x48b   :  { %471 = dma.vmem_to_hbm [thread:$0]  %s466_s15, 256, %s959_s11, [#allocation4], %s807_s16, %s807_s16, %s808_s17  }
 0x48c   :  { %s809_s2 = smov [#allocation17]  }
 0x48d   :  { %s477_s20 = sshll.u32 %s809_s2, 4  ;;  %s478_s20 = int_to_ptr.vmem [resolvable:$true] %s477_s20 }
 0x48e   :  { %s760_s21 = scalar_lea.vmem %s478_s20, 256  ;;  %p765_p4 = scmp.lt.s32.totalorder %s478_s20, %s478_s20 }
 0x48f   :  { %p761_p3 = scmp.ne.s32.totalorder %s478_s20, %s760_s21  ;;  %p766_p5 = scmp.lt.s32.totalorder %s760_s21, %s760_s21 }
 0x491   :  { %p767_p6 = por %p766_p5, %p765_p4 }
 0x493   :  { %p768_p7 = pnand %p767_p6, %p761_p3 }
 0x548   :  { %v450_v41 = vpop.f32.mrf.mxu0 }
 0x549   :  { %v451_v42 = vadd.f32 %v509_v40, %v450_v41 }
 0x54a   :  { %v544_v43 = vpop.f32.mrf.mxu0 }
 0x54b   :  { %458 = vst.msk [vmem:[#allocation17] sm:$0xff] %vm457_vm2, %v451_v42 }
 0x54c   :  { %v453_v44 = vpop.f32.mrf.mxu0 }
 0x54d   :  { %v454_v45 = vadd.f32 %v509_v40, %v453_v44 }
 0x54e   :  { %v545_v46 = vpop.f32.mrf.mxu0 }
 0x54f   :  { %459 = vst.msk [vmem:[#allocation17 + $0x8] sm:$0xff] %vm457_vm2, %v454_v45 }
 0x550   :  { %771 = shalt.err (!%p768_p7)
}
 0x551   :  { %483 = dma.vmem_to_hbm [thread:$0]  %s478_s20, 256, %s960_s12, [#allocation18], %s807_s16, %s807_s16, %s808_s17  }
 0x552   :  { %790 = dma.done.wait [#allocation4], 256  }
 0x553   :  { %791 = vsyncadd [#allocation4], 4294967040 }
 0x554   :  { %792 = dma.done.wait [#allocation18], 256  }
 0x555   :  { %793 = vsyncadd [#allocation18], 4294967040 }
 0x556   :  { %490 = vsyncpa [#allocation3], 1 }
 0x557   :  { %491 = vsyncpa [#allocation6], 1 }
 0x558   :  { %492 = vsyncpa [#allocation9], 1 }
 0x559   :  { %493 = vsyncpa [#allocation12], 1 }
 0x55a   :  { %494 = vsyncpa [#allocation15], 1 }
 0x55b   :  { %495 = vsyncpa [#allocation4], 1 }
 0x55c   :  { %496 = vsyncpa [#allocation18], 1 }

// kernel: decoder_layer_forward.1
= control target key start
LH: loop header
LB: loop body
LE: loop exit
PB: predicated region body
PF: predicated region fallthrough
CT: control target
= control target key end

     0   :  { %18 = vsyncpa [#allocation3], 0  ;;  %s948_s0 = inlined_call_operand.vmem [shape: f32[16,32], index: 0, kind: input, shape index: {}]   ;;  %s949_s1 = inlined_call_operand.hbm [shape: f32[1,32], index: 1, kind: input, shape index: {}]   ;;  %s950_s2 = inlined_call_operand.hbm [shape: f32[1,32], index: 2, kind: input, shape index: {}]   ;;  %s951_s3 = inlined_call_operand.vmem [shape: bf16[32,32], index: 3, kind: input, shape index: {}]   ;;  %s952_s4 = inlined_call_operand.hbm [shape: f32[1,32], index: 4, kind: input, shape index: {}]   ;;  %s953_s5 = inlined_call_operand.hbm [shape: bf16[32,32], index: 5, kind: input, shape index: {}]   ;;  %s954_s6 = inlined_call_operand.hbm [shape: f32[1,32], index: 6, kind: input, shape index: {}]   ;;  %s955_s7 = inlined_call_operand.hbm [shape: f32[1,32], index: 7, kind: input, shape index: {}]   ;;  %s956_s8 = inlined_call_operand.hbm [shape: f32[1,32], index: 8, kind: input, shape index: {}]   ;;  %s957_s9 = inlined_call_operand.vmem [shape: bf16[32,10], index: 9, kind: input, shape index: {}]   ;;  %s958_s10 = inlined_call_operand.hbm [shape: f32[1,10], index: 10, kind: input, shape index: {}]   ;;  %s959_s11 = inlined_call_operand.hbm [shape: f32[16,32], index: 11, kind: output, shape index: {0}]   ;;  %s960_s12 = inlined_call_operand.hbm [shape: f32[16,10], index: 12, kind: output, shape index: {1}]  }
   0x1   :  { %19 = vsyncpa [#allocation6], 0 }
   0x2   :  { %20 = vsyncpa [#allocation9], 0 }
   0x3   :  { %21 = vsyncpa [#allocation12], 0 }
   0x4   :  { %22 = vsyncpa [#allocation15], 0 }
   0x5   :  { %23 = vsyncpa [#allocation4], 0 }
   0x6   :  { %24 = vsyncpa [#allocation18], 0  ;;  %s794_s21 = smov [#allocation5]   ;;  %s795_s23 = smov [#allocation8]  }
   0x7   :  { %s43_s22 = sshll.u32 %s794_s21, 4  ;;  %s64_s24 = sshll.u32 %s795_s23, 4  ;;  %s44_s22 = int_to_ptr.vmem [resolvable:$true] %s43_s22  ;;  %s65_s24 = int_to_ptr.vmem [resolvable:$true] %s64_s24 }
   0x8   :  { %s588_s25 = scalar_lea.vmem %s44_s22, 16  ;;  %s592_s26 = scalar_lea.vmem %s44_s22, 32 }
   0x9   :  { %p589_p0 = scmp.ne.s32.totalorder %s44_s22, %s588_s25  ;;  %p593_p1 = scmp.lt.s32.totalorder %s44_s22, %s44_s22 }
   0xa   :  { %p594_p2 = scmp.lt.s32.totalorder %s592_s26, %s588_s25 }
   0xc   :  { %p595_p3 = por %p594_p2, %p593_p1 }
   0xe   :  { %p596_p4 = pnand %p595_p3, %p589_p0 }
  0x10   :  { %599 = shalt.err (!%p596_p4)
}
  0x11   :  { %46 = dma.hbm_to_vmem [thread:$0]  %s950_s2, 16, %s44_s22, [#allocation6]  }
  0x12   :  { %s608_s29 = scalar_lea.vmem %s65_s24, 256  ;;  %p613_p6 = scmp.lt.s32.totalorder %s65_s24, %s65_s24 }
  0x13   :  { %p609_p5 = scmp.ne.s32.totalorder %s65_s24, %s608_s29  ;;  %p614_p7 = scmp.lt.s32.totalorder %s608_s29, %s608_s29 }
  0x15   :  { %p615_p8 = por %p614_p7, %p613_p6 }
  0x17   :  { %p616_p9 = pnand %p615_p8, %p609_p5 }
  0x19   :  { %619 = shalt.err (!%p616_p9)
}
  0x1a   :  { %s796_s30 = smov 64   ;;  %s797_s13 = smov 4  }
  0x1b   :  { %70 = dma.hbm_to_vmem [thread:$0]  %s953_s5, 256, %s65_s24, [#allocation9], %s796_s30, %s796_s30, %s797_s13  }
  0x1c   :  { %s798_s16 = smov [#allocation11]   ;;  %s799_s18 = smov [#allocation2]  }
  0x1d   :  { %s87_s17 = sshll.u32 %s798_s16, 4  ;;  %s33_s19 = sshll.u32 %s799_s18, 4  ;;  %s88_s17 = int_to_ptr.vmem [resolvable:$true] %s87_s17  ;;  %s34_s19 = int_to_ptr.vmem [resolvable:$true] %s33_s19 }
  0x1e   :  { %s628_s2 = scalar_lea.vmem %s88_s17, 16  ;;  %s632_s20 = scalar_lea.vmem %s88_s17, 32 }
  0x1f   :  { %p629_p10 = scmp.ne.s32.totalorder %s88_s17, %s628_s2  ;;  %p633_p11 = scmp.lt.s32.totalorder %s88_s17, %s88_s17 }
  0x20   :  { %p634_p12 = scmp.lt.s32.totalorder %s632_s20, %s628_s2 }
  0x22   :  { %p635_p13 = por %p634_p12, %p633_p11 }
  0x24   :  { %p636_p0 = pnand %p635_p13, %p629_p10 }
  0x26   :  { %639 = shalt.err (!%p636_p0)
}
  0x27   :  { %90 = dma.hbm_to_vmem [thread:$0]  %s955_s7, 16, %s88_s17, [#allocation12]  }
  0x28   :  { %s648_s23 = scalar_lea.vmem %s34_s19, 16  ;;  %s652_s5 = scalar_lea.vmem %s34_s19, 32 }
  0x29   :  { %p649_p1 = scmp.ne.s32.totalorder %s34_s19, %s648_s23  ;;  %p653_p2 = scmp.lt.s32.totalorder %s34_s19, %s34_s19 }
  0x2a   :  { %p654_p3 = scmp.lt.s32.totalorder %s652_s5, %s648_s23 }
  0x2c   :  { %p655_p4 = por %p654_p3, %p653_p2 }
  0x2e   :  { %p656_p5 = pnand %p655_p4, %p649_p1 }
  0x30   :  { %659 = shalt.err (!%p656_p5)
}
  0x31   :  { %36 = dma.hbm_to_vmem [thread:$0]  %s949_s1, 16, %s34_s19, [#allocation3]  }
  0x32   :  { %s800_s26 = smov [#allocation7]   ;;  %s801_s28 = smov [#allocation10]  }
  0x33   :  { %s55_s27 = sshll.u32 %s800_s26, 4  ;;  %s77_s29 = sshll.u32 %s801_s28, 4  ;;  %s56_s27 = int_to_ptr.vmem [resolvable:$true] %s55_s27  ;;  %s78_s29 = int_to_ptr.vmem [resolvable:$true] %s77_s29 }
  0x34   :  { %s668_s30 = scalar_lea.vmem %s56_s27, 16  ;;  %s672_s7 = scalar_lea.vmem %s56_s27, 32 }
  0x35   :  { %p669_p6 = scmp.ne.s32.totalorder %s56_s27, %s668_s30  ;;  %p673_p7 = scmp.lt.s32.totalorder %s56_s27, %s56_s27 }
  0x36   :  { %p674_p8 = scmp.lt.s32.totalorder %s672_s7, %s668_s30 }
  0x38   :  { %p675_p9 = por %p674_p8, %p673_p7 }
  0x3a   :  { %p676_p10 = pnand %p675_p9, %p669_p6 }
  0x3c   :  { %679 = shalt.err (!%p676_p10)
}
  0x3d   :  { %58 = dma.hbm_to_vmem [thread:$0]  %s952_s4, 16, %s56_s27, [#allocation6]  }
  0x3e   :  { %s688_s15 = scalar_lea.vmem %s78_s29, 16  ;;  %s692_s1 = scalar_lea.vmem %s78_s29, 32 }
  0x3f   :  { %p689_p11 = scmp.ne.s32.totalorder %s78_s29, %s688_s15  ;;  %p693_p12 = scmp.lt.s32.totalorder %s78_s29, %s78_s29 }
  0x40   :  { %p694_p13 = scmp.lt.s32.totalorder %s692_s1, %s688_s15 }
  0x42   :  { %p695_p0 = por %p694_p13, %p693_p12 }
  0x44   :  { %p696_p1 = pnand %p695_p0, %p689_p11 }
  0x46   :  { %699 = shalt.err (!%p696_p1)
}
  0x47   :  { %80 = dma.hbm_to_vmem [thread:$0]  %s954_s6, 16, %s78_s29, [#allocation9]  }
  0x48   :  { %s802_s18 = smov [#allocation13]   ;;  %s803_s2 = smov [#allocation14]  }
  0x49   :  { %s97_s19 = sshll.u32 %s802_s18, 4  ;;  %s109_s20 = sshll.u32 %s803_s2, 4  ;;  %s98_s19 = int_to_ptr.vmem [resolvable:$true] %s97_s19  ;;  %s110_s20 = int_to_ptr.vmem [resolvable:$true] %s109_s20 }
  0x4a   :  { %s708_s21 = scalar_lea.vmem %s98_s19, 16  ;;  %s712_s4 = scalar_lea.vmem %s98_s19, 32 }
  0x4b   :  { %p709_p2 = scmp.ne.s32.totalorder %s98_s19, %s708_s21  ;;  %p713_p3 = scmp.lt.s32.totalorder %s98_s19, %s98_s19 }
  0x4c   :  { %p714_p4 = scmp.lt.s32.totalorder %s712_s4, %s708_s21 }
  0x4e   :  { %p715_p5 = por %p714_p4, %p713_p3 }
  0x50   :  { %p716_p6 = pnand %p715_p5, %p709_p2 }
  0x52   :  { %719 = shalt.err (!%p716_p6)
}
  0x53   :  { %100 = dma.hbm_to_vmem [thread:$0]  %s956_s8, 16, %s98_s19, [#allocation12]  }
  0x54   :  { %s728_s5 = scalar_lea.vmem %s110_s20, 16  ;;  %s732_s6 = scalar_lea.vmem %s110_s20, 32 }
  0x55   :  { %p729_p7 = scmp.ne.s32.totalorder %s110_s20, %s728_s5  ;;  %p733_p8 = scmp.lt.s32.totalorder %s110_s20, %s110_s20 }
  0x56   :  { %p734_p9 = scmp.lt.s32.totalorder %s732_s6, %s728_s5 }
  0x58   :  { %p735_p10 = por %p734_p9, %p733_p8 }
  0x5a   :  { %p736_p11 = pnand %p735_p10, %p729_p7 }
  0x5c   :  { %739 = shalt.err (!%p736_p11)
}
  0x5d   :  { %112 = dma.hbm_to_vmem [thread:$0]  %s958_s10, 16, %s110_s20, [#allocation15]  }
  0x5e   :  { %780 = dma.done.wait [#allocation3], 16  }
  0x5f   :  { %781 = vsyncadd [#allocation3], 4294967280 }
  0x60   :  { %782 = dma.done.wait [#allocation6], 32  }
  0x61   :  { %783 = vsyncadd [#allocation6], 4294967264 }
  0x62   :  { %784 = dma.done.wait [#allocation9], 272  }
  0x63   :  { %785 = vsyncadd [#allocation9], 4294967024 }
  0x64   :  { %786 = dma.done.wait [#allocation12], 32  }
  0x65   :  { %787 = vsyncadd [#allocation12], 4294967264 }
  0x66   :  { %788 = dma.done.wait [#allocation15], 16  }
  0x67   :  { %789 = vsyncadd [#allocation15], 4294967280  ;;  %v138_v0 = vld [vmem:[%s948_s0] sm:$0xff]  ;;  %vm144_vm0 = vcmask 261120   ;;  %v139_v1 = vld [vmem:[%s948_s0 + $0x8] sm:$0xff]  ;;  %v804_v17 = vmov 0.0  }
  0x68   :  { %v140_v2 = vadd.f32 %v138_v0, %v138_v0  ;;  %v141_v3 = vadd.f32 %v139_v1, %v139_v1  ;;  %v562_v16 = vld [vmem:[%s951_s3 + $0x8] sm:$0xff]   ;;  %522 = vmatprep.subr.bf16.mxu0 %v804_v17  ;;  %vm805_vm1 = vmmov 0   ;;  %v563_v18 = vld [vmem:[%s951_s3] sm:$0xff]   ;;  %530 = vmatprep.subr.bf16.mxu1 %v804_v17  ;;  %v503_v0 = vld [vmem:[#allocation10] ss:$0 sm:$0xff] }
  0x69   :  { %526 = vmatprep.mubr.msk.bf16.mxu0 %vm805_vm1, %v804_v17  ;;  %523 = vmatpush3.bf16.msra.mxu0 %v562_v16  ;;  %v497_v27 = vld [vmem:[#allocation2] ss:$0 sm:$0xff]  ;;  %v498_v31 = vld [vmem:[#allocation5] ss:$0 sm:$0xff]  ;;  %v564_v36 = vld [vmem:[#allocation8 + $0x8] sm:$0xff]  }
  0x6a   :  { %v145_v4 = vsel %vm144_vm0, %v140_v2, 0.0  ;;  %v148_v5 = vsel %vm144_vm0, %v141_v3, 0.0  ;;  %524 = vmatprep.subr.bf16.mxu0 %v804_v17  ;;  %534 = vmatprep.mubr.msk.bf16.mxu1 %vm805_vm1, %v804_v17  ;;  %v565_v37 = vld [vmem:[#allocation8] sm:$0xff]   ;;  %v499_v38 = vld [vmem:[#allocation7] ss:$0 sm:$0xff] }
  0x6b   :  { %146 = vadd.xlane.f32.xlu0 %v145_v4  ;;  %531 = vmatpush3.bf16.msra.mxu1 %v564_v36 }
  0x6c   :  { %532 = vmatprep.subr.bf16.mxu1 %v804_v17 }
  0x6d   :  { %525 = vmatpush3.bf16.msra.mxu0 %v563_v18 }
  0x6e   :  { %538 = vmatprep.subr.bf16.mxu0 %v804_v17 }
  0x6f   :  { %149 = vadd.xlane.f32.xlu0 %v148_v5  ;;  %533 = vmatpush3.bf16.msra.mxu1 %v565_v37 }
  0xf4   :  { %v147_v6 = vpop.xlane.xlu0 %146 }
  0xf5   :  { %v151_v7 = vmul.f32 0.03125, %v147_v6 }
  0xf7   :  { %v153_v8 = vsub.f32 %v140_v2, %v151_v7 }
  0xf8   :  { %v150_v9 = vpop.xlane.xlu0 %149 }
  0xf9   :  { %v152_v10 = vmul.f32 0.03125, %v150_v9  ;;  %v155_v11 = vmul.f32 %v153_v8, %v153_v8 }
  0xfb   :  { %v154_v12 = vsub.f32 %v141_v3, %v152_v10  ;;  %v157_v13 = vsel %vm144_vm0, %v155_v11, 0.0 }
  0xfc   :  { %158 = vadd.xlane.f32.xlu1 %v157_v13 }
  0xfd   :  { %v156_v14 = vmul.f32 %v154_v12, %v154_v12 }
  0xff   :  { %v160_v15 = vsel %vm144_vm0, %v156_v14, 0.0 }
 0x100   :  { %161 = vadd.xlane.f32.xlu1 %v160_v15 }
 0x185   :  { %v159_v19 = vpop.xlane.xlu1 %158 }
 0x186   :  { %v163_v20 = vmul.f32 0.03125, %v159_v19 }
 0x188   :  { %v165_v21 = vadd.f32 1e-05, %v163_v20 }
 0x189   :  { %v162_v22 = vpop.xlane.xlu1 %161 }
 0x18a   :  { %568 = vrsqrt.f32 %v165_v21  ;;  %v164_v23 = vmul.f32 0.03125, %v162_v22  ;;  %v566_v22 = vld [vmem:[%s957_s9 + $0x8] sm:$0xff]  }
 0x18c   :  { %v166_v24 = vadd.f32 1e-05, %v164_v23  ;;  %v567_v23 = vld [vmem:[%s957_s9] sm:$0xff]   ;;  %s806_s9 = smov [#allocation16]  }
 0x18d   :  { %s465_s15 = sshll.u32 %s806_s9, 4  ;;  %s466_s15 = int_to_ptr.vmem [resolvable:$true] %s465_s15 }
 0x18e   :  { %570 = vrsqrt.f32 %v166_v24  ;;  %s740_s1 = scalar_lea.vmem %s466_s15, 256  ;;  %p745_p13 = scmp.lt.s32.totalorder %s466_s15, %s466_s15 }
 0x18f   :  { %p741_p12 = scmp.ne.s32.totalorder %s466_s15, %s740_s1  ;;  %p746_p0 = scmp.lt.s32.totalorder %s740_s1, %s740_s1 }
 0x191   :  { %p747_p1 = por %p746_p0, %p745_p13 }
 0x193   :  { %p748_p2 = pnand %p747_p1, %p741_p12 }
 0x197   :  { %v569_v25 = vpop.eup %568 }
 0x198   :  { %v169_v26 = vmul.f32 %v569_v25, %v153_v8 }
 0x19a   :  { %v177_v30 = vmul.f32 %v497_v27, %v169_v26 }
 0x19b   :  { %v571_v28 = vpop.eup %570 }
 0x19c   :  { %v170_v29 = vmul.f32 %v571_v28, %v154_v12  ;;  %v185_v33 = vadd.f32 %v498_v31, %v177_v30 }
 0x19e   :  { %v178_v32 = vmul.f32 %v497_v27, %v170_v29 }
 0x1a0   :  { %v186_v34 = vadd.f32 %v498_v31, %v178_v32  ;;  %v507_v31 = vld [vmem:[#allocation11] ss:$0 sm:$0xff] }
 0x1a2   :  { %v187_v35 = vpack.c.bf16 %v186_v34, %v185_v33 }
 0x1a4   :  { %527 = vmatmul.mubr.msk.bf16.vlgmr.msra.gmra.mxu0 %vm144_vm0, %v187_v35 }
 0x1a5   :  { %542 = vmatprep.mubr.msk.bf16.mxu0 %vm805_vm1, %v804_v17  ;;  %539 = vmatpush3.bf16.msra.mxu0 %v566_v22 }
 0x1a6   :  { %540 = vmatprep.subr.bf16.mxu0 %v804_v17 }
 0x1a9   :  { %541 = vmatpush3.bf16.msra.mxu0 %v567_v23 }
 0x264   :  { %v248_v39 = vpop.f32.mrf.mxu0 }
 0x265   :  { %v249_v40 = vadd.f32 %v499_v38, %v248_v39 }
 0x266   :  { %v528_v41 = vpop.f32.mrf.mxu0 }
 0x267   :  { %v257_v42 = vmul.f32 0.044715, %v249_v40  ;;  %v255_v58 = vmul.f32 0.5, %v249_v40 }
 0x268   :  { %v251_v43 = vpop.f32.mrf.mxu0 }
 0x269   :  { %v259_v44 = vmul.f32 %v257_v42, %v249_v40  ;;  %v252_v45 = vadd.f32 %v499_v38, %v251_v43 }
 0x26a   :  { %v529_v46 = vpop.f32.mrf.mxu0 }
 0x26b   :  { %v261_v47 = vmul.f32 %v259_v44, %v249_v40  ;;  %v258_v48 = vmul.f32 0.044715, %v252_v45  ;;  %v256_v59 = vmul.f32 0.5, %v252_v45 }
 0x26d   :  { %v263_v49 = vadd.f32 %v261_v47, %v249_v40  ;;  %v260_v50 = vmul.f32 %v258_v48, %v252_v45 }
 0x26f   :  { %v265_v51 = vmul.f32 0.7978846, %v263_v49  ;;  %v262_v52 = vmul.f32 %v260_v50, %v252_v45 }
 0x271   :  { %572 = vtanh.f32 %v265_v51  ;;  %v264_v53 = vadd.f32 %v262_v52, %v252_v45 }
 0x273   :  { %v266_v54 = vmul.f32 0.7978846, %v264_v53 }
 0x275   :  { %574 = vtanh.f32 %v266_v54 }
 0x27e   :  { %v573_v55 = vpop.eup %572 }
 0x27f   :  { %v269_v56 = vadd.f32 1.0, %v573_v55 }
 0x281   :  { %v271_v61 = vmul.f32 %v269_v56, %v255_v58 }
 0x282   :  { %v575_v57 = vpop.eup %574 }
 0x283   :  { %v270_v60 = vadd.f32 1.0, %v575_v57 }
 0x285   :  { %v272_v62 = vmul.f32 %v270_v60, %v256_v59 }
 0x287   :  { %v273_v63 = vpack.c.bf16 %v272_v62, %v271_v61 }
 0x289   :  { %535 = vmatmul.mubr.msk.bf16.vlgmr.msra.gmra.mxu1 %vm144_vm0, %v273_v63 }
 0x349   :  { %v334_v1 = vpop.f32.mrf.mxu1 }
 0x34a   :  { %v335_v2 = vadd.f32 %v503_v0, %v334_v1 }
 0x34b   :  { %v536_v3 = vpop.f32.mrf.mxu1 }
 0x34c   :  { %v341_v4 = vadd.f32 %v335_v2, %v185_v33  ;;  %v508_v33 = vld [vmem:[#allocation13] ss:$0 sm:$0xff] }
 0x34d   :  { %v337_v5 = vpop.f32.mrf.mxu1 }
 0x34e   :  { %v338_v6 = vadd.f32 %v503_v0, %v337_v5  ;;  %v345_v7 = vsel %vm144_vm0, %v341_v4, 0.0 }
 0x34f   :  { %346 = vadd.xlane.f32.xlu0 %v345_v7  ;;  %v537_v8 = vpop.f32.mrf.mxu1 }
 0x350   :  { %v342_v9 = vadd.f32 %v338_v6, %v186_v34 }
 0x352   :  { %v348_v10 = vsel %vm144_vm0, %v342_v9, 0.0 }
 0x353   :  { %349 = vadd.xlane.f32.xlu1 %v348_v10 }
 0x3d8   :  { %v347_v11 = vpop.xlane.xlu0 %346 }
 0x3d9   :  { %v351_v12 = vmul.f32 0.03125, %v347_v11 }
 0x3db   :  { %v353_v13 = vsub.f32 %v341_v4, %v351_v12 }
 0x3dc   :  { %v350_v14 = vpop.xlane.xlu1 %349 }
 0x3dd   :  { %v352_v15 = vmul.f32 0.03125, %v350_v14  ;;  %v355_v16 = vmul.f32 %v353_v13, %v353_v13 }
 0x3df   :  { %v354_v18 = vsub.f32 %v342_v9, %v352_v15  ;;  %v357_v19 = vsel %vm144_vm0, %v355_v16, 0.0 }
 0x3e0   :  { %358 = vadd.xlane.f32.xlu0 %v357_v19 }
 0x3e1   :  { %v356_v20 = vmul.f32 %v354_v18, %v354_v18 }
 0x3e3   :  { %v360_v21 = vsel %vm144_vm0, %v356_v20, 0.0 }
 0x3e4   :  { %361 = vadd.xlane.f32.xlu1 %v360_v21 }
 0x469   :  { %v359_v24 = vpop.xlane.xlu0 %358 }
 0x46a   :  { %v363_v25 = vmul.f32 0.03125, %v359_v24 }
 0x46c   :  { %v365_v26 = vadd.f32 1e-05, %v363_v25 }
 0x46d   :  { %v362_v27 = vpop.xlane.xlu1 %361 }
 0x46e   :  { %576 = vrsqrt.f32 %v365_v26  ;;  %v364_v28 = vmul.f32 0.03125, %v362_v27 }
 0x470   :  { %v366_v29 = vadd.f32 1e-05, %v364_v28 }
 0x472   :  { %578 = vrsqrt.f32 %v366_v29 }
 0x47b   :  { %v577_v30 = vpop.eup %576 }
 0x47c   :  { %v369_v32 = vmul.f32 %v577_v30, %v353_v13 }
 0x47e   :  { %v377_v34 = vmul.f32 %v507_v31, %v369_v32 }
 0x47f   :  { %v579_v35 = vpop.eup %578 }
 0x480   :  { %v370_v36 = vmul.f32 %v579_v35, %v354_v18  ;;  %v385_v37 = vadd.f32 %v508_v33, %v377_v34 }
 0x482   :  { %v378_v38 = vmul.f32 %v507_v31, %v370_v36  ;;  %387 = vst.msk [vmem:[#allocation16] sm:$0xff] %vm144_vm0, %v385_v37 }
 0x484   :  { %v386_v17 = vadd.f32 %v508_v33, %v378_v38 }
 0x486   :  { %v389_v39 = vpack.c.bf16 %v386_v17, %v385_v37  ;;  %388 = vst.msk [vmem:[#allocation16 + $0x8] sm:$0xff] %vm144_vm0, %v386_v17 }
 0x488   :  { %543 = vmatmul.mubr.msk.bf16.vlgmr.msra.gmra.mxu0 %vm144_vm0, %v389_v39 }
 0x489   :  { %751 = shalt.err (!%p748_p2)
}
 0x48a   :  { %s807_s16 = smov 128   ;;  %s808_s17 = smov 8   ;;  %v509_v40 = vld [vmem:[#allocation14] ss:$0 sm:$0xff]  ;;  %vm457_vm2 = vcmask 80896  }
 0x48b   :  { %471 = dma.vmem_to_hbm [thread:$0]  %s466_s15, 256, %s959_s11, [#allocation4], %s807_s16, %s807_s16, %s808_s17  }
 0x48c   :  { %s809_s2 = smov [#allocation17]  }
 0x48d   :  { %s477_s20 = sshll.u32 %s809_s2, 4  ;;  %s478_s20 = int_to_ptr.vmem [resolvable:$true] %s477_s20 }
 0x48e   :  { %s760_s21 = scalar_lea.vmem %s478_s20, 256  ;;  %p765_p4 = scmp.lt.s32.totalorder %s478_s20, %s478_s20 }
 0x48f   :  { %p761_p3 = scmp.ne.s32.totalorder %s478_s20, %s760_s21  ;;  %p766_p5 = scmp.lt.s32.totalorder %s760_s21, %s760_s21 }
 0x491   :  { %p767_p6 = por %p766_p5, %p765_p4 }
 0x493   :  { %p768_p7 = pnand %p767_p6, %p761_p3 }
 0x548   :  { %v450_v41 = vpop.f32.mrf.mxu0 }
 0x549   :  { %v451_v42 = vadd.f32 %v509_v40, %v450_v41 }
 0x54a   :  { %v544_v43 = vpop.f32.mrf.mxu0 }
 0x54b   :  { %458 = vst.msk [vmem:[#allocation17] sm:$0xff] %vm457_vm2, %v451_v42 }
 0x54c   :  { %v453_v44 = vpop.f32.mrf.mxu0 }
 0x54d   :  { %v454_v45 = vadd.f32 %v509_v40, %v453_v44 }
 0x54e   :  { %v545_v46 = vpop.f32.mrf.mxu0 }
 0x54f   :  { %459 = vst.msk [vmem:[#allocation17 + $0x8] sm:$0xff] %vm457_vm2, %v454_v45 }
 0x550   :  { %771 = shalt.err (!%p768_p7)
}
 0x551   :  { %483 = dma.vmem_to_hbm [thread:$0]  %s478_s20, 256, %s960_s12, [#allocation18], %s807_s16, %s807_s16, %s808_s17  }
 0x552   :  { %790 = dma.done.wait [#allocation4], 256  }
 0x553   :  { %791 = vsyncadd [#allocation4], 4294967040 }
 0x554   :  { %792 = dma.done.wait [#allocation18], 256  }
 0x555   :  { %793 = vsyncadd [#allocation18], 4294967040 }
 0x556   :  { %490 = vsyncpa [#allocation3], 1 }
 0x557   :  { %491 = vsyncpa [#allocation6], 1 }
 0x558   :  { %492 = vsyncpa [#allocation9], 1 }
 0x559   :  { %493 = vsyncpa [#allocation12], 1 }
 0x55a   :  { %494 = vsyncpa [#allocation15], 1 }
 0x55b   :  { %495 = vsyncpa [#allocation4], 1 }
 0x55c   :  { %496 = vsyncpa [#allocation18], 1 }

</bundles_post_ra>
